<compile_context>
chip_gen: v6e
topology: v6e:2x2x1
jax: 0.10.0
libtpu: 0.0.40
codegen_flags: <defaults>
</compile_context>

<pallas_src>
import functools
import math

import jax
import jax.numpy as jnp
from jax import lax
from jax.experimental import pallas as pl
from jax.experimental.pallas import tpu as pltpu


# ----------------------------------------------------------------------------
# Helpers
# ----------------------------------------------------------------------------

def _vmem_limit(resident_bytes):
    # Never below the v6e/v7x scoped default (32 MiB) so small shapes are
    # unaffected; never above v7x physical VMEM (64 MiB) so it is valid on all
    # current chips.
    return int(min(64 << 20, max(32 << 20, 3 * int(resident_bytes))))


_BUFFERED_1 = pl.Buffered(1) if hasattr(pl, "Buffered") else None


def _const_spec(shape):
    """Whole-array block, constant index_map (DMA'd once across the grid).

    Weights are revisited with the same block index every grid step, so ask for
    single buffering when the API supports it (halves weight VMEM footprint).
    """
    ndim = len(shape)

    def idx(b):  # noqa: ANN001 - grid index
        return (0,) * ndim

    if _BUFFERED_1 is not None:
        try:
            return pl.BlockSpec(shape, idx, pipeline_mode=_BUFFERED_1)
        except TypeError:
            pass
    return pl.BlockSpec(shape, idx)


# ----------------------------------------------------------------------------
# Fused decoder-layer kernel
# ----------------------------------------------------------------------------

def _decoder_layer_kernel(x_ref,
                          wqkv_ref, bqkv_ref,
                          wo_ref, bo_ref,
                          ln1g_ref, ln1b_ref,
                          wff1_ref, bff1_ref,
                          wff2_ref, bff2_ref,
                          ln2g_ref, ln2b_ref,
                          o_ref, *, num_heads, eps):
    # x block: [1, S, D] bf16 (one batch element per grid step)
    xb = x_ref[0]                                   # [S, D] bf16 (MXU input)
    x = xb.astype(jnp.float32)                      # [S, D] f32 (residual path)
    S, D = x.shape
    H = num_heads
    Dh = D // H

    def layernorm(y, g, b):
        # One-pass variance: E[x^2] - mu^2 (less VPU work, esp. on v5e).
        mu = jnp.mean(y, axis=-1, keepdims=True)
        var = jnp.mean(y * y, axis=-1, keepdims=True) - mu * mu
        return (y - mu) * lax.rsqrt(var + eps) * g + b

    # --- QKV projection (1/sqrt(Dh) pre-folded into the Q slice of W/b) ------
    qkv = jnp.dot(xb, wqkv_ref[...],
                  preferred_element_type=jnp.float32) + bqkv_ref[...]   # [S,3D] f32
    q = qkv[:, :D].reshape(S, H, Dh).astype(jnp.bfloat16)               # [S,H,Dh]
    k = qkv[:, D:2 * D].reshape(S, H, Dh).astype(jnp.bfloat16)
    v = qkv[:, 2 * D:].reshape(S, H, Dh).astype(jnp.bfloat16)

    # Causal mask bias: finite large negative (diagonal unmasked -> no NaN rows,
    # and no inf-inf pitfalls if rows were ever fully masked).
    row = lax.broadcasted_iota(jnp.int32, (S, S), 0)
    col = lax.broadcasted_iota(jnp.int32, (S, S), 1)
    mask_bias = jnp.where(col <= row, 0.0, -1e30).astype(jnp.float32)

    # --- multi-head causal attention: ONE batched dot_general over heads -----
    # scores: [H, S, S] = q[s,h,d] . k[t,h,d] batched over h
    s = lax.dot_general(q, k, (((2,), (2,)), ((1,), (1,))),
                        preferred_element_type=jnp.float32)
    s = s + mask_bias[None, :, :]
    m = jnp.max(s, axis=-1, keepdims=True)
    p = jnp.exp(s - m)
    p = p / jnp.sum(p, axis=-1, keepdims=True)      # exact softmax normalization
    # context: [H, S, Dh] = p[h,s,t] . v[t,h,d] batched over h
    ctx = lax.dot_general(p.astype(jnp.bfloat16), v,
                          (((2,), (0,)), ((0,), (1,))),
                          preferred_element_type=jnp.float32)
    attn = ctx.transpose(1, 0, 2).reshape(S, D)     # [S, D] lane-dense

    attn = jnp.dot(attn.astype(jnp.bfloat16), wo_ref[...],
                   preferred_element_type=jnp.float32) + bo_ref[...]

    # --- residual + LayerNorm 1 ----------------------------------------------
    x1 = layernorm(x + attn, ln1g_ref[...], ln1b_ref[...])

    # --- feed-forward ---------------------------------------------------------
    h1 = jnp.dot(x1.astype(jnp.bfloat16), wff1_ref[...],
                 preferred_element_type=jnp.float32) + bff1_ref[...]
    h1 = jnp.maximum(h1, 0.0)
    ff = jnp.dot(h1.astype(jnp.bfloat16), wff2_ref[...],
                 preferred_element_type=jnp.float32) + bff2_ref[...]

    # --- residual + LayerNorm 2 ----------------------------------------------
    x2 = layernorm(x1 + ff, ln2g_ref[...], ln2b_ref[...])
    o_ref[0] = x2.astype(o_ref.dtype)               # bf16 inter-layer carry


def decoder_layer(x, layer, num_heads, eps=1e-5):
    """x: [B, S, D] bf16 -> [B, S, D] bf16. One fused pallas_call, grid over B."""
    B, S, D = x.shape
    F = layer["w_ff1"].shape[1]
    H = num_heads

    # VMEM budget estimate (weights + x in/out double-buffer + f32 intermediates)
    weight_bytes = 2 * (D * 3 * D + D * D + D * F + F * D)          # bf16 matmul weights
    small_bytes = 4 * (3 * D + 6 * D + F)                           # f32 biases / LN params
    act_bytes = 2 * 2 * (S * D * 2)                                 # bf16 x in+out, 2 buffers
    interm_bytes = 4 * (S * 3 * D + H * S * S + S * F + 6 * S * D)  # f32 in-kernel temporaries
    vmem_limit = _vmem_limit(weight_bytes + small_bytes + act_bytes + interm_bytes)

    flops = B * (2 * S * D * 3 * D        # QKV proj
                 + 4 * S * S * D          # scores + PV
                 + 2 * S * D * D          # out proj
                 + 4 * S * D * F)         # FF1 + FF2
    transcendentals = B * (H * S * S + 2 * S)        # exp + rsqrt
    bytes_accessed = weight_bytes + small_bytes + B * S * D * 2 * 2

    xspec = pl.BlockSpec((1, S, D), lambda b: (b, 0, 0))
    return pl.pallas_call(
        functools.partial(_decoder_layer_kernel, num_heads=num_heads, eps=eps),
        out_shape=jax.ShapeDtypeStruct((B, S, D), jnp.bfloat16),
        grid=(B,),
        in_specs=[
            xspec,
            _const_spec((D, 3 * D)), _const_spec((1, 3 * D)),
            _const_spec((D, D)), _const_spec((1, D)),
            _const_spec((1, D)), _const_spec((1, D)),
            _const_spec((D, F)), _const_spec((1, F)),
            _const_spec((F, D)), _const_spec((1, D)),
            _const_spec((1, D)), _const_spec((1, D)),
        ],
        out_specs=xspec,
        compiler_params=pltpu.CompilerParams(
            dimension_semantics=("parallel",),   # v7x: shard batches over 2 TCs
            vmem_limit_bytes=vmem_limit),
        cost_estimate=pl.CostEstimate(flops=flops,
                                      transcendentals=transcendentals,
                                      bytes_accessed=bytes_accessed),
    )(x,
      layer["w_qkv"], layer["b_qkv"].reshape(1, -1),
      layer["w_o"], layer["b_o"].reshape(1, -1),
      layer["ln1_g"].reshape(1, -1), layer["ln1_b"].reshape(1, -1),
      layer["w_ff1"], layer["b_ff1"].reshape(1, -1),
      layer["w_ff2"], layer["b_ff2"].reshape(1, -1),
      layer["ln2_g"].reshape(1, -1), layer["ln2_b"].reshape(1, -1))


# ----------------------------------------------------------------------------
# Embedding: DMA row gather (no one-hot matmul, no [M, V] VMEM slab)
# ----------------------------------------------------------------------------

def _gather_kernel(ids_ref, row_ref, o_ref):
    del ids_ref                                   # consumed by the index_map
    o_ref[...] = row_ref[...].astype(o_ref.dtype)


def embedding_lookup(ids_flat, table, out_dtype=jnp.bfloat16):
    """ids_flat: [M] int32, table: [V, D] f32 -> [M, D] (bf16 carry)."""
    M = int(ids_flat.shape[0])
    V, D = table.shape
    table3 = table.reshape(V, 1, D)               # blocks equal full minor dims
    out = pl.pallas_call(
        _gather_kernel,
        out_shape=jax.ShapeDtypeStruct((M, 1, D), out_dtype),
        grid_spec=pltpu.PrefetchScalarGridSpec(
            num_scalar_prefetch=1,
            grid=(M,),
            # index_map receives (grid idx, *prefetch refs): fetch row ids[i]
            in_specs=[pl.BlockSpec((1, 1, D), lambda i, ids: (ids[i], 0, 0))],
            out_specs=pl.BlockSpec((1, 1, D), lambda i, ids: (i, 0, 0)),
        ),
        compiler_params=pltpu.CompilerParams(
            dimension_semantics=("arbitrary",),
            vmem_limit_bytes=_vmem_limit(8 * D * 4)),
        cost_estimate=pl.CostEstimate(flops=0, transcendentals=0,
                                      bytes_accessed=M * D * 6 + M * 4),
    )(ids_flat.astype(jnp.int32), table3)
    return out.reshape(M, D)


# ----------------------------------------------------------------------------
# Output (vocab) projection
# ----------------------------------------------------------------------------

def _matmul_bias_kernel(x_ref, w_ref, b_ref, o_ref):
    # bf16 MXU inputs, f32 accumulation, f32 bias add.
    y = jnp.dot(x_ref[...], w_ref[...], preferred_element_type=jnp.float32)
    o_ref[...] = (y + b_ref[...]).astype(o_ref.dtype)


def output_projection(x, w, b):
    """x: [M, D] bf16 @ w: [D, V] bf16 + b: [V] f32 -> [M, V] f32 logits."""
    # TODO(synk): for realistic vocab sizes tile over (M//tm, V//tn) with
    # tn = 512-2048 lanes (multiple of 256 on v6e/v7x) so the full [D,V] weight
    # and [M,V] output never need to be VMEM-resident.
    M, D = x.shape
    V = w.shape[1]
    resident = M * D * 2 + D * V * 2 + V * 4 + M * V * 4
    return pl.pallas_call(
        _matmul_bias_kernel,
        out_shape=jax.ShapeDtypeStruct((M, V), jnp.float32),
        compiler_params=pltpu.CompilerParams(
            vmem_limit_bytes=_vmem_limit(resident)),
        cost_estimate=pl.CostEstimate(flops=2 * M * D * V, transcendentals=0,
                                      bytes_accessed=resident),
    )(x, w, b.reshape(1, V))


# ----------------------------------------------------------------------------
# Parameter init (deterministic; matmul weights stored in bf16,
# 1/sqrt(head_dim) folded into the Q slice of the QKV projection)
# ----------------------------------------------------------------------------

def init_params(key, vocab_size, embed_dim, num_heads, ff_dim, num_layers):
    keys = jax.random.split(key, 2 + 6 * num_layers)
    kidx = 0
    head_dim = embed_dim // num_heads
    scale = 1.0 / math.sqrt(head_dim)

    def nrm(k, shape, s=0.02):
        return (s * jax.random.normal(k, shape)).astype(jnp.float32)

    params = {
        "embed": nrm(keys[kidx], (vocab_size, embed_dim)),                  # f32
        "out_w": nrm(keys[kidx + 1], (embed_dim, vocab_size)).astype(jnp.bfloat16),
        "out_b": jnp.zeros((vocab_size,), jnp.float32),
        "layers": [],
    }
    kidx += 2
    for _ in range(num_layers):
        lk = keys[kidx:kidx + 6]
        kidx += 6
        w_qkv = nrm(lk[0], (embed_dim, 3 * embed_dim))
        b_qkv = jnp.zeros((3 * embed_dim,), jnp.float32)
        # fold attention scale into the Q projection
        q_scale = jnp.concatenate([jnp.full((embed_dim,), scale, jnp.float32),
                                   jnp.ones((2 * embed_dim,), jnp.float32)])
        w_qkv = w_qkv * q_scale[None, :]
        b_qkv = b_qkv * q_scale
        layer = {
            "w_qkv": w_qkv.astype(jnp.bfloat16),
            "b_qkv": b_qkv,
            "w_o":   nrm(lk[1], (embed_dim, embed_dim)).astype(jnp.bfloat16),
            "b_o":   jnp.zeros((embed_dim,), jnp.float32),
            "ln1_g": jnp.ones((embed_dim,), jnp.float32),
            "ln1_b": jnp.zeros((embed_dim,), jnp.float32),
            "w_ff1": nrm(lk[2], (embed_dim, ff_dim)).astype(jnp.bfloat16),
            "b_ff1": jnp.zeros((ff_dim,), jnp.float32),
            "w_ff2": nrm(lk[3], (ff_dim, embed_dim)).astype(jnp.bfloat16),
            "b_ff2": jnp.zeros((embed_dim,), jnp.float32),
            "ln2_g": jnp.ones((embed_dim,), jnp.float32),
            "ln2_b": jnp.zeros((embed_dim,), jnp.float32),
        }
        params["layers"].append(layer)
    return params


# ----------------------------------------------------------------------------
# Forward pass: 1 gather call + 1 fused call per layer + 1 logits call
# ----------------------------------------------------------------------------

def sakhi_forward(params, tgt_input, num_heads):
    B, S = tgt_input.shape
    D = params["embed"].shape[1]

    x = embedding_lookup(tgt_input.reshape(B * S), params["embed"])   # [B*S, D] bf16
    x = x.reshape(B, S, D)

    for layer in params["layers"]:
        x = decoder_layer(x, layer, num_heads)                        # [B, S, D] bf16

    logits = output_projection(x.reshape(B * S, D), params["out_w"], params["out_b"])
    return logits.reshape(B, S, -1)


# ----------------------------------------------------------------------------
# Pure-JAX reference (mirrors the kernel's bf16-matmul / f32-accumulate /
# bf16-carry numerics)
# ----------------------------------------------------------------------------

def sakhi_forward_ref(params, tgt_input, num_heads):
    B, S = tgt_input.shape
    D = params["embed"].shape[1]
    Dh = D // num_heads
    mask = jnp.where(jnp.tril(jnp.ones((S, S), bool)), 0.0, -1e30).astype(jnp.float32)

    def bdot(a, b):
        return jnp.dot(a.astype(jnp.bfloat16), b.astype(jnp.bfloat16),
                       preferred_element_type=jnp.float32)

    def layernorm(y, g, b):
        mu = y.mean(-1, keepdims=True)
        var = (y * y).mean(-1, keepdims=True) - mu * mu
        return (y - mu) * lax.rsqrt(var + 1e-5) * g + b

    xb = params["embed"][tgt_input.reshape(-1)].astype(jnp.bfloat16)     # [B*S, D]
    for layer in params["layers"]:
        x = xb.astype(jnp.float32)
        qkv = bdot(xb, layer["w_qkv"]) + layer["b_qkv"]
        q, k, v = jnp.split(qkv, 3, axis=-1)
        q = q.reshape(B, S, num_heads, Dh).transpose(0, 2, 1, 3)
        k = k.reshape(B, S, num_heads, Dh).transpose(0, 2, 1, 3)
        v = v.reshape(B, S, num_heads, Dh).transpose(0, 2, 1, 3)
        s = jnp.einsum("bhqd,bhkd->bhqk", q.astype(jnp.bfloat16), k.astype(jnp.bfloat16),
                       preferred_element_type=jnp.float32) + mask        # scale folded in W_q
        m = jnp.max(s, axis=-1, keepdims=True)
        p = jnp.exp(s - m)
        p = p / jnp.sum(p, axis=-1, keepdims=True)
        a = jnp.einsum("bhqk,bhkd->bhqd", p.astype(jnp.bfloat16), v.astype(jnp.bfloat16),
                       preferred_element_type=jnp.float32)
        a = a.transpose(0, 2, 1, 3).reshape(B * S, D)
        a = bdot(a, layer["w_o"]) + layer["b_o"]
        x1 = layernorm(x + a, layer["ln1_g"], layer["ln1_b"])
        h = jnp.maximum(bdot(x1, layer["w_ff1"]) + layer["b_ff1"], 0.0)
        ff = bdot(h, layer["w_ff2"]) + layer["b_ff2"]
        x2 = layernorm(x1 + ff, layer["ln2_g"], layer["ln2_b"])
        xb = x2.astype(jnp.bfloat16)
    logits = bdot(xb, params["out_w"]) + params["out_b"]
    return logits.reshape(B, S, -1)


# ----------------------------------------------------------------------------
# Main
# ----------------------------------------------------------------------------

if __name__ == "__main__":
    EMBED_DIM = 32
    NUM_HEADS = 4
    FF_DIM = 64
    VOCAB_SIZE = 64
    NUM_LAYERS = 2
    BATCH = 2
    SEQ = 8

    key = jax.random.PRNGKey(0)
    pkey, ikey = jax.random.split(key)
    params = init_params(pkey, VOCAB_SIZE, EMBED_DIM, NUM_HEADS, FF_DIM, NUM_LAYERS)
    tgt_input = jax.random.randint(ikey, (BATCH, SEQ), 0, VOCAB_SIZE, dtype=jnp.int32)

    fwd = jax.jit(functools.partial(sakhi_forward, num_heads=NUM_HEADS))
    logits = jax.block_until_ready(fwd(params, tgt_input))
    assert logits.shape == (BATCH, SEQ, VOCAB_SIZE)

    ref = jax.block_until_ready(sakhi_forward_ref(params, tgt_input, NUM_HEADS))
    # Kernel and reference use identical math (bf16 MXU inputs, f32 accumulation,
    # bf16 inter-layer carry); remaining diffs are f32 accumulation-order /
    # bf16 rounding-boundary effects only.
    assert jnp.allclose(logits, ref, atol=5e-3, rtol=5e-3), "Pallas output mismatch vs reference"
    assert not jnp.any(jnp.isnan(logits)), "NaN in logits"

    print("KERNEL_OK")
</pallas_src>

<mosaic_0001>
module attributes {stable_mosaic.version = 11 : i64} {
  func.func @_gather_kernel(%arg0: i32, %arg1: memref<16xi32, #tpu.memory_space<smem>>, %arg2: memref<1x1x32xf32, #tpu.memory_space<vmem>>, %arg3: memref<1x1x32xbf16, #tpu.memory_space<vmem>>) attributes {dimension_semantics = [#tpu.dimension_semantics<arbitrary>], iteration_bounds = array<i64: 16>, scalar_prefetch = 1 : i64, scratch_operands = 0 : i64, tpu.core_type = #tpu.core_type<tc>, window_params = [{transform_indices = @transform_0, window_bounds = array<i64: 1, 1, 32>}, {transform_indices = @transform_1, window_bounds = array<i64: 1, 1, 32>}]} {
    %c0 = arith.constant 0 : index
    %c0_0 = arith.constant 0 : index
    %c0_1 = arith.constant 0 : index
    %0 = vector.load %arg2[%c0, %c0_0, %c0_1] : memref<1x1x32xf32, #tpu.memory_space<vmem>>, vector<1x1x32xf32>
    %1 = arith.truncf %0 : vector<1x1x32xf32> to vector<1x1x32xbf16>
    %c0_2 = arith.constant 0 : index
    %c0_3 = arith.constant 0 : index
    %c0_4 = arith.constant 0 : index
    %2 = vector.load %arg3[%c0_2, %c0_3, %c0_4] : memref<1x1x32xbf16, #tpu.memory_space<vmem>>, vector<1x1x32xbf16>
    tpu.vector_store %arg3[%c0_2, %c0_3, %c0_4], %1 {strides = array<i32>} : memref<1x1x32xbf16, #tpu.memory_space<vmem>>, vector<1x1x32xbf16>,
    return
  }
  func.func @transform_0(%arg0: i32, %arg1: memref<16xi32, #tpu.memory_space<smem>>) -> (i32, i32, i32) {
    %0 = arith.index_cast %arg0 : i32 to index
    %1 = memref.load %arg1[%0] : memref<16xi32, #tpu.memory_space<smem>>
    %c0_i32 = arith.constant 0 : i32
    %c0_i32_0 = arith.constant 0 : i32
    %c0_i32_1 = arith.constant 0 : i32
    return %1, %c0_i32, %c0_i32_0 : i32, i32, i32
  }
  func.func @transform_1(%arg0: i32, %arg1: memref<16xi32, #tpu.memory_space<smem>>) -> (i32, i32, i32) {
    %c0_i32 = arith.constant 0 : i32
    %c0_i32_0 = arith.constant 0 : i32
    %c0_i32_1 = arith.constant 0 : i32
    return %arg0, %c0_i32, %c0_i32_0 : i32, i32, i32
  }
}

module attributes {stable_mosaic.version = 11 : i64} {
  func.func @_decoder_layer_kernel(%arg0: i32, %arg1: memref<1x8x32xbf16, #tpu.memory_space<vmem>>, %arg2: memref<32x96xbf16, #tpu.memory_space<vmem>>, %arg3: memref<1x96xf32, #tpu.memory_space<vmem>>, %arg4: memref<32x32xbf16, #tpu.memory_space<vmem>>, %arg5: memref<1x32xf32, #tpu.memory_space<vmem>>, %arg6: memref<1x32xf32, #tpu.memory_space<vmem>>, %arg7: memref<1x32xf32, #tpu.memory_space<vmem>>, %arg8: memref<32x64xbf16, #tpu.memory_space<vmem>>, %arg9: memref<1x64xf32, #tpu.memory_space<vmem>>, %arg10: memref<64x32xbf16, #tpu.memory_space<vmem>>, %arg11: memref<1x32xf32, #tpu.memory_space<vmem>>, %arg12: memref<1x32xf32, #tpu.memory_space<vmem>>, %arg13: memref<1x32xf32, #tpu.memory_space<vmem>>, %arg14: memref<1x8x32xbf16, #tpu.memory_space<vmem>>) attributes {dimension_semantics = [#tpu.dimension_semantics<parallel>], iteration_bounds = array<i64: 2>, scalar_prefetch = 0 : i64, scratch_operands = 0 : i64, tpu.core_type = #tpu.core_type<tc>, window_params = [{transform_indices = @transform_0, window_bounds = array<i64: 1, 8, 32>}, {pipeline_mode = #tpu.pipeline_mode<synchronous>, transform_indices = @transform_1, window_bounds = array<i64: 32, 96>}, {pipeline_mode = #tpu.pipeline_mode<synchronous>, transform_indices = @transform_2, window_bounds = array<i64: 1, 96>}, {pipeline_mode = #tpu.pipeline_mode<synchronous>, transform_indices = @transform_3, window_bounds = array<i64: 32, 32>}, {pipeline_mode = #tpu.pipeline_mode<synchronous>, transform_indices = @transform_4, window_bounds = array<i64: 1, 32>}, {pipeline_mode = #tpu.pipeline_mode<synchronous>, transform_indices = @transform_5, window_bounds = array<i64: 1, 32>}, {pipeline_mode = #tpu.pipeline_mode<synchronous>, transform_indices = @transform_6, window_bounds = array<i64: 1, 32>}, {pipeline_mode = #tpu.pipeline_mode<synchronous>, transform_indices = @transform_7, window_bounds = array<i64: 32, 64>}, {pipeline_mode = #tpu.pipeline_mode<synchronous>, transform_indices = @transform_8, window_bounds = array<i64: 1, 64>}, {pipeline_mode = #tpu.pipeline_mode<synchronous>, transform_indices = @transform_9, window_bounds = array<i64: 64, 32>}, {pipeline_mode = #tpu.pipeline_mode<synchronous>, transform_indices = @transform_10, window_bounds = array<i64: 1, 32>}, {pipeline_mode = #tpu.pipeline_mode<synchronous>, transform_indices = @transform_11, window_bounds = array<i64: 1, 32>}, {pipeline_mode = #tpu.pipeline_mode<synchronous>, transform_indices = @transform_12, window_bounds = array<i64: 1, 32>}, {transform_indices = @transform_13, window_bounds = array<i64: 1, 8, 32>}]} {
    %c0 = arith.constant 0 : index
    %c0_0 = arith.constant 0 : index
    %c0_1 = arith.constant 0 : index
    %0 = vector.load %arg1[%c0, %c0_0, %c0_1] : memref<1x8x32xbf16, #tpu.memory_space<vmem>>, vector<1x8x32xbf16>
    %1 = vector.shape_cast %0 : vector<1x8x32xbf16> to vector<8x32xbf16>
    %2 = arith.extf %1 : vector<8x32xbf16> to vector<8x32xf32>
    %c0_2 = arith.constant 0 : index
    %c0_3 = arith.constant 0 : index
    %3 = vector.load %arg2[%c0_2, %c0_3] : memref<32x96xbf16, #tpu.memory_space<vmem>>, vector<32x96xbf16>
    %cst = arith.constant dense<0.000000e+00> : vector<8x96xf32>
    %4 = tpu.matmul %1, %3, %cst {dimension_numbers = #tpu.dot_dimension_numbers<[1], [0], [0], [1], [0, 0, 1, 1], [], []>} : vector<8x32xbf16>, vector<32x96xbf16>, vector<8x96xf32> -> vector<8x96xf32>
    %c0_4 = arith.constant 0 : index
    %c0_5 = arith.constant 0 : index
    %5 = vector.load %arg3[%c0_4, %c0_5] : memref<1x96xf32, #tpu.memory_space<vmem>>, vector<1x96xf32>
    %6 = vector.broadcast %5 : vector<1x96xf32> to vector<8x96xf32>
    %7 = arith.addf %4, %6 : vector<8x96xf32>
    %8 = vector.extract_strided_slice %7 {offsets = [0, 0], sizes = [8, 32], strides = [1, 1]} : vector<8x96xf32> to vector<8x32xf32>
    %9 = vector.shape_cast %8 : vector<8x32xf32> to vector<8x4x8xf32>
    %10 = arith.truncf %9 : vector<8x4x8xf32> to vector<8x4x8xbf16>
    %11 = vector.extract_strided_slice %7 {offsets = [0, 32], sizes = [8, 32], strides = [1, 1]} : vector<8x96xf32> to vector<8x32xf32>
    %12 = vector.shape_cast %11 : vector<8x32xf32> to vector<8x4x8xf32>
    %13 = arith.truncf %12 : vector<8x4x8xf32> to vector<8x4x8xbf16>
    %14 = vector.extract_strided_slice %7 {offsets = [0, 64], sizes = [8, 32], strides = [1, 1]} : vector<8x96xf32> to vector<8x32xf32>
    %15 = vector.shape_cast %14 : vector<8x32xf32> to vector<8x4x8xf32>
    %16 = arith.truncf %15 : vector<8x4x8xf32> to vector<8x4x8xbf16>
    %17 = tpu.iota {dimensions = array<i32: 0>} : vector<8x8xi32>
    %18 = tpu.iota {dimensions = array<i32: 1>} : vector<8x8xi32>
    %19 = arith.cmpi sle, %18, %17 : vector<8x8xi32>
    %cst_6 = arith.constant 0.000000e+00 : f32
    %cst_7 = arith.constant -1.000000e+30 : f32
    %20 = vector.broadcast %cst_6 : f32 to vector<8x8xf32>
    %21 = vector.broadcast %cst_7 : f32 to vector<8x8xf32>
    %22 = arith.select %19, %20, %21 : vector<8x8xi1>, vector<8x8xf32>
    %cst_8 = arith.constant dense<0.000000e+00> : vector<4x8x8xf32>
    %23 = tpu.matmul %10, %13, %cst_8 {dimension_numbers = #tpu.dot_dimension_numbers<[2], [2], [0], [0], [0, 1, 0, 0, 1, 0], [1], [1]>} : vector<8x4x8xbf16>, vector<8x4x8xbf16>, vector<4x8x8xf32> -> vector<4x8x8xf32>
    %24 = vector.shape_cast %22 : vector<8x8xf32> to vector<1x8x8xf32>
    %25 = vector.broadcast %24 : vector<1x8x8xf32> to vector<4x8x8xf32>
    %26 = arith.addf %23, %25 : vector<4x8x8xf32>
    %cst_9 = arith.constant dense<0xFF800000> : vector<4x8xf32>
    %27 = vector.multi_reduction <maximumf>, %26, %cst_9 [2] : vector<4x8x8xf32> to vector<4x8xf32>
    %28 = vector.shape_cast %27 : vector<4x8xf32> to vector<4x8x1xf32>
    %29 = vector.broadcast %28 : vector<4x8x1xf32> to vector<4x8x8xf32>
    %30 = arith.subf %26, %29 : vector<4x8x8xf32>
    %31 = math.exp %30 : vector<4x8x8xf32>
    %cst_10 = arith.constant dense<0.000000e+00> : vector<4x8xf32>
    %32 = vector.multi_reduction <add>, %31, %cst_10 [2] : vector<4x8x8xf32> to vector<4x8xf32>
    %33 = vector.shape_cast %32 : vector<4x8xf32> to vector<4x8x1xf32>
    %34 = vector.broadcast %33 : vector<4x8x1xf32> to vector<4x8x8xf32>
    %35 = arith.divf %31, %34 : vector<4x8x8xf32>
    %36 = arith.truncf %35 : vector<4x8x8xf32> to vector<4x8x8xbf16>
    %cst_11 = arith.constant dense<0.000000e+00> : vector<4x8x8xf32>
    %37 = tpu.matmul %36, %16, %cst_11 {dimension_numbers = #tpu.dot_dimension_numbers<[2], [0], [1], [2], [0, 0, 0, 1, 1, 2], [0], [1]>} : vector<4x8x8xbf16>, vector<8x4x8xbf16>, vector<4x8x8xf32> -> vector<4x8x8xf32>
    %38 = tpu.transpose %37, [1, 0, 2] : vector<4x8x8xf32> -> vector<8x4x8xf32>
    %39 = vector.shape_cast %38 : vector<8x4x8xf32> to vector<8x32xf32>
    %40 = arith.truncf %39 : vector<8x32xf32> to vector<8x32xbf16>
    %c0_12 = arith.constant 0 : index
    %c0_13 = arith.constant 0 : index
    %41 = vector.load %arg4[%c0_12, %c0_13] : memref<32x32xbf16, #tpu.memory_space<vmem>>, vector<32x32xbf16>
    %cst_14 = arith.constant dense<0.000000e+00> : vector<8x32xf32>
    %42 = tpu.matmul %40, %41, %cst_14 {dimension_numbers = #tpu.dot_dimension_numbers<[1], [0], [0], [1], [0, 0, 1, 1], [], []>} : vector<8x32xbf16>, vector<32x32xbf16>, vector<8x32xf32> -> vector<8x32xf32>
    %c0_15 = arith.constant 0 : index
    %c0_16 = arith.constant 0 : index
    %43 = vector.load %arg5[%c0_15, %c0_16] : memref<1x32xf32, #tpu.memory_space<vmem>>, vector<1x32xf32>
    %44 = vector.broadcast %43 : vector<1x32xf32> to vector<8x32xf32>
    %45 = arith.addf %42, %44 : vector<8x32xf32>
    %46 = arith.addf %2, %45 : vector<8x32xf32>
    %c0_17 = arith.constant 0 : index
    %c0_18 = arith.constant 0 : index
    %47 = vector.load %arg6[%c0_17, %c0_18] : memref<1x32xf32, #tpu.memory_space<vmem>>, vector<1x32xf32>
    %c0_19 = arith.constant 0 : index
    %c0_20 = arith.constant 0 : index
    %48 = vector.load %arg7[%c0_19, %c0_20] : memref<1x32xf32, #tpu.memory_space<vmem>>, vector<1x32xf32>
    %cst_21 = arith.constant dense<0.000000e+00> : vector<8xf32>
    %49 = vector.multi_reduction <add>, %46, %cst_21 [1] : vector<8x32xf32> to vector<8xf32>
    %50 = vector.shape_cast %49 : vector<8xf32> to vector<8x1xf32>
    %cst_22 = arith.constant 3.200000e+01 : f32
    %51 = vector.broadcast %cst_22 : f32 to vector<8x1xf32>
    %52 = arith.divf %50, %51 : vector<8x1xf32>
    %53 = arith.mulf %46, %46 : vector<8x32xf32>
    %cst_23 = arith.constant dense<0.000000e+00> : vector<8xf32>
    %54 = vector.multi_reduction <add>, %53, %cst_23 [1] : vector<8x32xf32> to vector<8xf32>
    %55 = vector.shape_cast %54 : vector<8xf32> to vector<8x1xf32>
    %cst_24 = arith.constant 3.200000e+01 : f32
    %56 = vector.broadcast %cst_24 : f32 to vector<8x1xf32>
    %57 = arith.divf %55, %56 : vector<8x1xf32>
    %58 = arith.mulf %52, %52 : vector<8x1xf32>
    %59 = arith.subf %57, %58 : vector<8x1xf32>
    %60 = vector.broadcast %52 : vector<8x1xf32> to vector<8x32xf32>
    %61 = arith.subf %46, %60 : vector<8x32xf32>
    %cst_25 = arith.constant 9.99999974E-6 : f32
    %62 = vector.broadcast %cst_25 : f32 to vector<8x1xf32>
    %63 = arith.addf %59, %62 : vector<8x1xf32>
    %64 = math.rsqrt %63 : vector<8x1xf32>
    %65 = vector.broadcast %64 : vector<8x1xf32> to vector<8x32xf32>
    %66 = arith.mulf %61, %65 : vector<8x32xf32>
    %67 = vector.broadcast %47 : vector<1x32xf32> to vector<8x32xf32>
    %68 = arith.mulf %66, %67 : vector<8x32xf32>
    %69 = vector.broadcast %48 : vector<1x32xf32> to vector<8x32xf32>
    %70 = arith.addf %68, %69 : vector<8x32xf32>
    %71 = arith.truncf %70 : vector<8x32xf32> to vector<8x32xbf16>
    %c0_26 = arith.constant 0 : index
    %c0_27 = arith.constant 0 : index
    %72 = vector.load %arg8[%c0_26, %c0_27] : memref<32x64xbf16, #tpu.memory_space<vmem>>, vector<32x64xbf16>
    %cst_28 = arith.constant dense<0.000000e+00> : vector<8x64xf32>
    %73 = tpu.matmul %71, %72, %cst_28 {dimension_numbers = #tpu.dot_dimension_numbers<[1], [0], [0], [1], [0, 0, 1, 1], [], []>} : vector<8x32xbf16>, vector<32x64xbf16>, vector<8x64xf32> -> vector<8x64xf32>
    %c0_29 = arith.constant 0 : index
    %c0_30 = arith.constant 0 : index
    %74 = vector.load %arg9[%c0_29, %c0_30] : memref<1x64xf32, #tpu.memory_space<vmem>>, vector<1x64xf32>
    %75 = vector.broadcast %74 : vector<1x64xf32> to vector<8x64xf32>
    %76 = arith.addf %73, %75 : vector<8x64xf32>
    %cst_31 = arith.constant 0.000000e+00 : f32
    %77 = vector.broadcast %cst_31 : f32 to vector<8x64xf32>
    %78 = arith.maximumf %76, %77 : vector<8x64xf32>
    %79 = arith.truncf %78 : vector<8x64xf32> to vector<8x64xbf16>
    %c0_32 = arith.constant 0 : index
    %c0_33 = arith.constant 0 : index
    %80 = vector.load %arg10[%c0_32, %c0_33] : memref<64x32xbf16, #tpu.memory_space<vmem>>, vector<64x32xbf16>
    %cst_34 = arith.constant dense<0.000000e+00> : vector<8x32xf32>
    %81 = tpu.matmul %79, %80, %cst_34 {dimension_numbers = #tpu.dot_dimension_numbers<[1], [0], [0], [1], [0, 0, 1, 1], [], []>} : vector<8x64xbf16>, vector<64x32xbf16>, vector<8x32xf32> -> vector<8x32xf32>
    %c0_35 = arith.constant 0 : index
    %c0_36 = arith.constant 0 : index
    %82 = vector.load %arg11[%c0_35, %c0_36] : memref<1x32xf32, #tpu.memory_space<vmem>>, vector<1x32xf32>
    %83 = vector.broadcast %82 : vector<1x32xf32> to vector<8x32xf32>
    %84 = arith.addf %81, %83 : vector<8x32xf32>
    %85 = arith.addf %70, %84 : vector<8x32xf32>
    %c0_37 = arith.constant 0 : index
    %c0_38 = arith.constant 0 : index
    %86 = vector.load %arg12[%c0_37, %c0_38] : memref<1x32xf32, #tpu.memory_space<vmem>>, vector<1x32xf32>
    %c0_39 = arith.constant 0 : index
    %c0_40 = arith.constant 0 : index
    %87 = vector.load %arg13[%c0_39, %c0_40] : memref<1x32xf32, #tpu.memory_space<vmem>>, vector<1x32xf32>
    %cst_41 = arith.constant dense<0.000000e+00> : vector<8xf32>
    %88 = vector.multi_reduction <add>, %85, %cst_41 [1] : vector<8x32xf32> to vector<8xf32>
    %89 = vector.shape_cast %88 : vector<8xf32> to vector<8x1xf32>
    %cst_42 = arith.constant 3.200000e+01 : f32
    %90 = vector.broadcast %cst_42 : f32 to vector<8x1xf32>
    %91 = arith.divf %89, %90 : vector<8x1xf32>
    %92 = arith.mulf %85, %85 : vector<8x32xf32>
    %cst_43 = arith.constant dense<0.000000e+00> : vector<8xf32>
    %93 = vector.multi_reduction <add>, %92, %cst_43 [1] : vector<8x32xf32> to vector<8xf32>
    %94 = vector.shape_cast %93 : vector<8xf32> to vector<8x1xf32>
    %cst_44 = arith.constant 3.200000e+01 : f32
    %95 = vector.broadcast %cst_44 : f32 to vector<8x1xf32>
    %96 = arith.divf %94, %95 : vector<8x1xf32>
    %97 = arith.mulf %91, %91 : vector<8x1xf32>
    %98 = arith.subf %96, %97 : vector<8x1xf32>
    %99 = vector.broadcast %91 : vector<8x1xf32> to vector<8x32xf32>
    %100 = arith.subf %85, %99 : vector<8x32xf32>
    %cst_45 = arith.constant 9.99999974E-6 : f32
    %101 = vector.broadcast %cst_45 : f32 to vector<8x1xf32>
    %102 = arith.addf %98, %101 : vector<8x1xf32>
    %103 = math.rsqrt %102 : vector<8x1xf32>
    %104 = vector.broadcast %103 : vector<8x1xf32> to vector<8x32xf32>
    %105 = arith.mulf %100, %104 : vector<8x32xf32>
    %106 = vector.broadcast %86 : vector<1x32xf32> to vector<8x32xf32>
    %107 = arith.mulf %105, %106 : vector<8x32xf32>
    %108 = vector.broadcast %87 : vector<1x32xf32> to vector<8x32xf32>
    %109 = arith.addf %107, %108 : vector<8x32xf32>
    %110 = arith.truncf %109 : vector<8x32xf32> to vector<8x32xbf16>
    %c0_46 = arith.constant 0 : index
    %c0_47 = arith.constant 0 : index
    %c0_48 = arith.constant 0 : index
    %111 = vector.load %arg14[%c0_46, %c0_47, %c0_48] : memref<1x8x32xbf16, #tpu.memory_space<vmem>>, vector<1x8x32xbf16>
    %112 = vector.shape_cast %111 : vector<1x8x32xbf16> to vector<8x32xbf16>
    %113 = vector.shape_cast %110 : vector<8x32xbf16> to vector<1x8x32xbf16>
    tpu.vector_store %arg14[%c0_46, %c0_47, %c0_48], %113 {strides = array<i32>} : memref<1x8x32xbf16, #tpu.memory_space<vmem>>, vector<1x8x32xbf16>,
    return
  }
  func.func @transform_0(%arg0: i32) -> (i32, i32, i32) {
    %c0_i32 = arith.constant 0 : i32
    %c0_i32_0 = arith.constant 0 : i32
    %c0_i32_1 = arith.constant 0 : i32
    return %arg0, %c0_i32, %c0_i32_0 : i32, i32, i32
  }
  func.func @transform_1(%arg0: i32) -> (i32, i32) {
    %c0_i32 = arith.constant 0 : i32
    %c0_i32_0 = arith.constant 0 : i32
    %c0_i32_1 = arith.constant 0 : i32
    return %c0_i32, %c0_i32_0 : i32, i32
  }
  func.func @transform_2(%arg0: i32) -> (i32, i32) {
    %c0_i32 = arith.constant 0 : i32
    %c0_i32_0 = arith.constant 0 : i32
    %c0_i32_1 = arith.constant 0 : i32
    return %c0_i32, %c0_i32_0 : i32, i32
  }
  func.func @transform_3(%arg0: i32) -> (i32, i32) {
    %c0_i32 = arith.constant 0 : i32
    %c0_i32_0 = arith.constant 0 : i32
    %c0_i32_1 = arith.constant 0 : i32
    return %c0_i32, %c0_i32_0 : i32, i32
  }
  func.func @transform_4(%arg0: i32) -> (i32, i32) {
    %c0_i32 = arith.constant 0 : i32
    %c0_i32_0 = arith.constant 0 : i32
    %c0_i32_1 = arith.constant 0 : i32
    return %c0_i32, %c0_i32_0 : i32, i32
  }
  func.func @transform_5(%arg0: i32) -> (i32, i32) {
    %c0_i32 = arith.constant 0 : i32
    %c0_i32_0 = arith.constant 0 : i32
    %c0_i32_1 = arith.constant 0 : i32
    return %c0_i32, %c0_i32_0 : i32, i32
  }
  func.func @transform_6(%arg0: i32) -> (i32, i32) {
    %c0_i32 = arith.constant 0 : i32
    %c0_i32_0 = arith.constant 0 : i32
    %c0_i32_1 = arith.constant 0 : i32
    return %c0_i32, %c0_i32_0 : i32, i32
  }
  func.func @transform_7(%arg0: i32) -> (i32, i32) {
    %c0_i32 = arith.constant 0 : i32
    %c0_i32_0 = arith.constant 0 : i32
    %c0_i32_1 = arith.constant 0 : i32
    return %c0_i32, %c0_i32_0 : i32, i32
  }
  func.func @transform_8(%arg0: i32) -> (i32, i32) {
    %c0_i32 = arith.constant 0 : i32
    %c0_i32_0 = arith.constant 0 : i32
    %c0_i32_1 = arith.constant 0 : i32
    return %c0_i32, %c0_i32_0 : i32, i32
  }
  func.func @transform_9(%arg0: i32) -> (i32, i32) {
    %c0_i32 = arith.constant 0 : i32
    %c0_i32_0 = arith.constant 0 : i32
    %c0_i32_1 = arith.constant 0 : i32
    return %c0_i32, %c0_i32_0 : i32, i32
  }
  func.func @transform_10(%arg0: i32) -> (i32, i32) {
    %c0_i32 = arith.constant 0 : i32
    %c0_i32_0 = arith.constant 0 : i32
    %c0_i32_1 = arith.constant 0 : i32
    return %c0_i32, %c0_i32_0 : i32, i32
  }
  func.func @transform_11(%arg0: i32) -> (i32, i32) {
    %c0_i32 = arith.constant 0 : i32
    %c0_i32_0 = arith.constant 0 : i32
    %c0_i32_1 = arith.constant 0 : i32
    return %c0_i32, %c0_i32_0 : i32, i32
  }
  func.func @transform_12(%arg0: i32) -> (i32, i32) {
    %c0_i32 = arith.constant 0 : i32
    %c0_i32_0 = arith.constant 0 : i32
    %c0_i32_1 = arith.constant 0 : i32
    return %c0_i32, %c0_i32_0 : i32, i32
  }
  func.func @transform_13(%arg0: i32) -> (i32, i32, i32) {
    %c0_i32 = arith.constant 0 : i32
    %c0_i32_0 = arith.constant 0 : i32
    %c0_i32_1 = arith.constant 0 : i32
    return %arg0, %c0_i32, %c0_i32_0 : i32, i32, i32
  }
}

module attributes {stable_mosaic.version = 11 : i64} {
  func.func @_matmul_bias_kernel(%arg0: memref<16x32xbf16, #tpu.memory_space<vmem>>, %arg1: memref<32x64xbf16, #tpu.memory_space<vmem>>, %arg2: memref<1x64xf32, #tpu.memory_space<vmem>>, %arg3: memref<16x64xf32, #tpu.memory_space<vmem>>) attributes {dimension_semantics = [], scalar_prefetch = 0 : i64, scratch_operands = 0 : i64, tpu.core_type = #tpu.core_type<tc>} {
    %c0 = arith.constant 0 : index
    %c0_0 = arith.constant 0 : index
    %0 = vector.load %arg0[%c0, %c0_0] : memref<16x32xbf16, #tpu.memory_space<vmem>>, vector<16x32xbf16>
    %c0_1 = arith.constant 0 : index
    %c0_2 = arith.constant 0 : index
    %1 = vector.load %arg1[%c0_1, %c0_2] : memref<32x64xbf16, #tpu.memory_space<vmem>>, vector<32x64xbf16>
    %cst = arith.constant dense<0.000000e+00> : vector<16x64xf32>
    %2 = tpu.matmul %0, %1, %cst {dimension_numbers = #tpu.dot_dimension_numbers<[1], [0], [0], [1], [0, 0, 1, 1], [], []>} : vector<16x32xbf16>, vector<32x64xbf16>, vector<16x64xf32> -> vector<16x64xf32>
    %c0_3 = arith.constant 0 : index
    %c0_4 = arith.constant 0 : index
    %3 = vector.load %arg2[%c0_3, %c0_4] : memref<1x64xf32, #tpu.memory_space<vmem>>, vector<1x64xf32>
    %4 = vector.broadcast %3 : vector<1x64xf32> to vector<16x64xf32>
    %5 = arith.addf %2, %4 : vector<16x64xf32>
    %c0_5 = arith.constant 0 : index
    %c0_6 = arith.constant 0 : index
    %6 = vector.load %arg3[%c0_5, %c0_6] : memref<16x64xf32, #tpu.memory_space<vmem>>, vector<16x64xf32>
    tpu.vector_store %arg3[%c0_5, %c0_6], %5 {strides = array<i32>} : memref<16x64xf32, #tpu.memory_space<vmem>>, vector<16x64xf32>,
    return
  }
}

</mosaic_0001>

<bundles_post_ra>
// kernel: sakhi_forward.4
= control target key start
LH: loop header
LB: loop body
LE: loop exit
PB: predicated region body
PF: predicated region fallthrough
CT: control target
= control target key end

     0   :  { %s236_s0 = inlined_call_operand.vmem [shape: s32[16], index: 0, kind: input, shape index: {}]   ;;  %s237_s1 = inlined_call_operand.vmem [shape: f32[64,1,32], index: 1, kind: input, shape index: {}]   ;;  %s238_s2 = inlined_call_operand.vmem [shape: bf16[16,1,32], index: 2, kind: output, shape index: {}]  }
   0x1   :  { %s7_s11 = sshll.u32 %s236_s0, 4  ;;  %s8_s11 = int_to_ptr.vmem [resolvable:$true] %s7_s11 }
   0x2   :  { %s189_s12 = scalar_lea.vmem %s8_s11, 16  ;;  %p194_p1 = scmp.lt.s32.totalorder %s8_s11, %s8_s11 }
   0x3   :  { %p190_p0 = scmp.ne.s32.totalorder %s8_s11, %s189_s12  ;;  %p195_p2 = scmp.lt.s32.totalorder %s189_s12, %s189_s12 }
   0x5   :  { %p196_p3 = por %p195_p2, %p194_p1 }
   0x7   :  { %p197_p4 = pnand %p196_p3, %p190_p0 }
   0x9   :  { %200 = shalt.err (!%p197_p4)  }
   0xa   :  { %s211_s13 = smov [#allocation3]  }
   0xb   :  { %10 = dma.vmem_to_smem %s8_s11, 16, %s211_s13, [#allocation2] }
   0xc   :  { %205 = dma.done.wait [#allocation2], 16 }
   0xd   :  { %206 = vsyncadd [#allocation2], 4294967280 }
   0xe   :  { %12 = sfence }
   0xf   :  { %s207_s14 = smov 0  }
  0x10 LB: > { %s173_s15 = sadd.s32 4294967295, %s209_s14   ;;  %p177_p5 = scmp.ge.s32.totalorder %s209_s14, 1  ;;  %s209_s14 = sphi %s207_s14, %s18_s14  }
  0x11   : > { %p96_p6 = scmp.lt.s32.totalorder %s209_s14, 17 }
  0x13   : > { %p97_p7 = pnand %p177_p5, %p96_p6 }
  0x14   : > { %s113_s0 = sld [smem:[#allocation3 + %s173_s15]] (!%p97_p7)  ;;  %p118_p8 = scmp.lt.s32.totalorder (!%p97_p7), %s173_s15, 15 }
  0x15   : > { %100 = sbr.rel (%p97_p7) target bundleno = 35 (0x23), region = 24 }
  0x1a   : > { %s240_s15 = smov (!%p118_p8, %s173_s15), 15  ;;  %p114_p9 = scmp.lt.s32.totalorder %s113_s0, 63  ;;  %vm123_vm0 = vcmask 253952   ;;  %vm124_vm1 = vsmask.f32 256 }
  0x1b   : > { %s120_s18 = scalar_lea.vmem %s238_s2, %s240_s15  ;;  %vm125_vm2 = vmand %vm123_vm0, %vm124_vm1 }
  0x1c   : > { %s242_s0 = smov (!%p114_p9, %s113_s0), 63  ;;  %v126_v1 = vld [vmem:[%s120_s18] sm:$0x1] }
  0x1d   : > { %s116_s21 = scalar_lea.vmem %s237_s1, %s242_s0 }
  0x1e   : > { %v121_v0 = vld [vmem:[%s116_s21] sm:$0x1] }
  0x1f   : > { %v122_v2 = vpack.c.bf16 %v121_v0, %v121_v0 }
  0x21   : > { %v127_v3 = vsel %vm125_vm2, %v122_v2, %v126_v1 }
  0x22   : > { %128 = vst [vmem:[%s120_s18] sm:$0x1] %v127_v3 }
  0x23 PF: > { %s18_s14 = sadd.s32 1, %s209_s14  }
  0x24   : > { %p15_p10 = scmp.ge.s32.totalorder %s18_s14, 18  }
  0x26   :  { %17 = sbr.rel (!%p15_p10) target bundleno = 16 (0x10), region = 54 }

// kernel: sakhi_forward.7
= control target key start
LH: loop header
LB: loop body
LE: loop exit
PB: predicated region body
PF: predicated region fallthrough
CT: control target
= control target key end

     0   :  { %v156_v1 = vmov 0.0   ;;  %vm157_vm0 = vmmov 0   ;;  %s196_s0 = inlined_call_operand.vmem [shape: bf16[16,32], index: 0, kind: input, shape index: {}]   ;;  %s197_s1 = inlined_call_operand.vmem [shape: bf16[32,64], index: 1, kind: input, shape index: {}]   ;;  %s198_s2 = inlined_call_operand.vmem [shape: f32[1,64], index: 2, kind: input, shape index: {}]   ;;  %s199_s3 = inlined_call_operand.hbm [shape: f32[16,64], index: 3, kind: output, shape index: {}]  }
   0x1   :  { %v131_v0 = vld [vmem:[%s197_s1 + $0x8] sm:$0xff]   ;;  %118 = vmatprep.subr.bf16.mxu0 %v156_v1  ;;  %v132_v2 = vld [vmem:[%s197_s1] sm:$0xff]   ;;  %122 = vmatprep.mubr.msk.bf16.mxu0 %vm157_vm0, %v156_v1 }
   0x2   :  { %119 = vmatpush3.bf16.msra.mxu0 %v131_v0 }
   0x3   :  { %120 = vmatprep.subr.bf16.mxu0 %v156_v1 }
   0x4   :  { %8 = vsyncpa [#allocation3], 0  ;;  %v133_v3 = vld [vmem:[%s196_s0] sm:$0xff]   ;;  %vm46_vm1 = vcmask 261120   ;;  %vm91_vm2 = vcmask 523264   ;;  %s158_s20 = smov [#allocation2]  }
   0x5   :  { %v110_v4 = vld [vmem:[%s198_s2] ss:$0 sm:$0xff]  ;;  %s99_s1 = sshll.u32 %s158_s20, 4  ;;  %s100_s1 = int_to_ptr.vmem [resolvable:$true] %s99_s1 }
   0x6   :  { %121 = vmatpush3.bf16.msra.mxu0 %v132_v2  ;;  %s134_s0 = scalar_lea.vmem %s100_s1, 256  ;;  %p139_p1 = scmp.lt.s32.totalorder %s100_s1, %s100_s1 }
   0x7   :  { %p135_p0 = scmp.ne.s32.totalorder %s100_s1, %s134_s0  ;;  %p140_p2 = scmp.lt.s32.totalorder %s134_s0, %s134_s0 }
   0x9   :  { %123 = vmatmul.mubr.msk.bf16.vlgmr.msra.gmra.mxu0 %vm46_vm1, %v133_v3  ;;  %p141_p3 = por %p140_p2, %p139_p1 }
   0xb   :  { %p142_p4 = pnand %p141_p3, %p135_p0 }
  0xc9   :  { %v84_v5 = vpop.f32.mrf.mxu0 }
  0xca   :  { %v85_v6 = vadd.f32 %v110_v4, %v84_v5 }
  0xcb   :  { %v124_v7 = vpop.f32.mrf.mxu0 }
  0xcc   :  { %92 = vst.msk [vmem:[#allocation2] sm:$0xff] %vm91_vm2, %v85_v6 }
  0xcd   :  { %v87_v8 = vpop.f32.mrf.mxu0 }
  0xce   :  { %v88_v9 = vadd.f32 %v110_v4, %v87_v8 }
  0xcf   :  { %v125_v10 = vpop.f32.mrf.mxu0 }
  0xd0   :  { %93 = vst.msk [vmem:[#allocation2 + $0x8] sm:$0xff] %vm91_vm2, %v88_v9 }
  0xd1   :  { %145 = shalt.err (!%p142_p4)
}
  0xd2   :  { %s159_s2 = smov 128   ;;  %s160_s21 = smov 8  }
  0xd3   :  { %105 = dma.vmem_to_hbm [thread:$0]  %s100_s1, 256, %s199_s3, [#allocation3], %s159_s2, %s159_s2, %s160_s21  }
  0xd4   :  { %154 = dma.done.wait [#allocation3], 256  }
  0xd5   :  { %155 = vsyncadd [#allocation3], 4294967040 }
  0xd6   :  { %109 = vsyncpa [#allocation3], 1 }

// kernel: sakhi_forward.5
= control target key start
LH: loop header
LB: loop body
LE: loop exit
PB: predicated region body
PF: predicated region fallthrough
CT: control target
= control target key end

     0   :  { %s2534_s25 = smov 0   ;;  %s2832_s0 = inlined_call_operand.vmem [shape: bf16[2,8,32], index: 0, kind: input, shape index: {}]   ;;  %s2833_s1 = inlined_call_operand.vmem [shape: bf16[32,96], index: 1, kind: input, shape index: {}]   ;;  %s2834_s2 = inlined_call_operand.vmem [shape: f32[1,96], index: 2, kind: input, shape index: {}]   ;;  %s2835_s3 = inlined_call_operand.vmem [shape: bf16[32,32], index: 3, kind: input, shape index: {}]   ;;  %s2836_s4 = inlined_call_operand.vmem [shape: f32[1,32], index: 4, kind: input, shape index: {}]   ;;  %s2837_s5 = inlined_call_operand.vmem [shape: f32[1,32], index: 5, kind: input, shape index: {}]   ;;  %s2838_s6 = inlined_call_operand.vmem [shape: f32[1,32], index: 6, kind: input, shape index: {}]   ;;  %s2839_s7 = inlined_call_operand.vmem [shape: bf16[32,64], index: 7, kind: input, shape index: {}]   ;;  %s2840_s8 = inlined_call_operand.vmem [shape: f32[1,64], index: 8, kind: input, shape index: {}]   ;;  %s2841_s9 = inlined_call_operand.vmem [shape: bf16[64,32], index: 9, kind: input, shape index: {}]   ;;  %s2842_s10 = inlined_call_operand.vmem [shape: f32[1,32], index: 10, kind: input, shape index: {}]   ;;  %s2843_s11 = inlined_call_operand.vmem [shape: f32[1,32], index: 11, kind: input, shape index: {}]   ;;  %s2844_s12 = inlined_call_operand.vmem [shape: f32[1,32], index: 12, kind: input, shape index: {}]   ;;  %s2845_s13 = inlined_call_operand.vmem [shape: bf16[2,8,32], index: 13, kind: output, shape index: {}]  }
   0x1 LB: > { %s2227_s26 = sadd.s32 4294967295, %s2448_s25   ;;  %p2231_p0 = scmp.ge.s32.totalorder %s2448_s25, 1  ;;  %s2448_s25 = sphi %s2534_s25, %s23_s25  }
   0x2   : > { %p386_p1 = scmp.lt.s32.totalorder %s2448_s25, 3 }
   0x4   : > { %p387_p2 = pnand %p2231_p0, %p386_p1 }
   0x5   : > { %p428_p3 = scmp.lt.s32.totalorder (!%p387_p2), %s2227_s26, 1  ;;  %s2452_s20 = smov (!%p387_p2), 104  }
   0x6   : > { %390 = sbr.rel (%p387_p2) target bundleno = 2544 (0x9f0), region = 72  ;;  %s2453_s21 = smov (!%p387_p2), 120  }
   0x7   : > { %s2454_s22 = smov (!%p387_p2), 96   ;;  %s2455_s23 = smov (!%p387_p2), 112  }
   0x8   : > { %s2460_s24 = smov (!%p387_p2), 64   ;;  %s2461_s15 = smov (!%p387_p2), 16  }
   0x9   : > { %s2462_s16 = smov (!%p387_p2), 8  }
   0xb   : > { %v2412_v0 = vld [vmem:[%s2833_s1 + $0x8] sm:$0xff]   ;;  %v2450_v1 = vmov 0.0   ;;  %v2413_v2 = vld [vmem:[%s2833_s1] sm:$0xff]   ;;  %vm2451_vm0 = vmmov 0   ;;  %s2847_s26 = smov (!%p428_p3, %s2227_s26), 1  ;;  %vm462_vm1 = vcmask 261120   ;;  %v521_v15 = vlaneseq }
   0xc   : > { %2306 = vmatprep.subr.bf16.mxu0 %v2450_v1  ;;  %2314 = vmatprep.subr.bf16.mxu1 %v2450_v1  ;;  %s2232_s14 = sshll.u32 %s2847_s26, 2  ;;  %v2234_v4 = vld [vmem:[%s2834_s2] ss:$0 sm:$0xff]  ;;  %v2456_v13 = vmov 1983009808   ;;  %vm1258_vm2 = vcmask 1043456  }
   0xd   : > { %2307 = vmatpush3.bf16.msra.mxu0 %v2412_v0  ;;  %2310 = vmatprep.mubr.msk.bf16.mxu0 %vm2451_vm0, %v2450_v1  ;;  %s431_s17 = scalar_lea.vmem %s2832_s0, %s2232_s14  ;;  %v519_v14 = vunpack.c.l.s4 %v2456_v13  ;;  %v2589_v17 = vshrl.u32 %v521_v15, 7  ;;  %v2457_v19 = vmov 1934713408   ;;  %vm1254_vm3 = vcmask 64512   ;;  %s435_s18 = scalar_lea.vmem %s2845_s13, %s2232_s14 }
   0xe   : > { %2308 = vmatprep.subr.bf16.mxu0 %v2450_v1  ;;  %2316 = vmatprep.mubr.msk.bf16.mxu1 %vm2451_vm0, %v2450_v1  ;;  %v2564_v3 = vld [vmem:[%s431_s17] sm:$0xf]  ;;  %v551_v20 = vunpack.c.l.s4 %v2457_v19  ;;  %s2463_s17 = smov 24   ;;  %vm1883_vm5 = vcmask 130048   ;;  %vm1885_vm6 = vcmask 195584   ;;  %vm2095_vm7 = vcmask 523264  }
   0xf   : > { %v520_v16 = vunpack.c.0.s8 %v519_v14  ;;  %vm2172_vm8 = vcmask 257024  }
  0x10   : > { %v552_v23 = vunpack.c.0.s8 %v551_v20 }
  0x11   : > { %2309 = vmatpush3.bf16.msra.mxu0 %v2413_v2  ;;  %v2592_v22 = vsub.s32 %v520_v16, %v2589_v17 }
  0x12   : > { %2338 = vmatprep.subr.bf16.mxu0 %v2450_v1  ;;  %v2599_v34 = vsub.s32 %v552_v23, %v2589_v17 }
  0x14   : > { %2311 = vmatmul.mubr.msk.bf16.vlgmr.msra.gmra.mxu0 %vm462_vm1, %v2564_v3 }
  0x15   : > { %2340 = vmatprep.mubr.msk.bf16.mxu0 %vm2451_vm0, %v2450_v1 }
  0xd4   : > { %v500_v5 = vpop.f32.mrf.mxu0 }
  0xd5   : > { %v2573_v6 = vadd.f32 %v2234_v4, %v500_v5 }
  0xd6   : > { %v2312_v7 = vpop.f32.mrf.mxu0 }
  0xd7   : > { %513 = vrot.lane.b32.xlu1 %v2573_v6, %s2452_s20  ;;  %507 = vrot.lane.b32.xlu0 %v2573_v6, %s2453_s21 }
  0xd8   : > { %v503_v8 = vpop.f32.mrf.mxu0 }
  0xda   : > { %v2313_v9 = vpop.f32.mrf.mxu0 }
  0xdb   : > { %592 = vrot.lane.b32.xlu1 %v2573_v6, %s2454_s22  ;;  %510 = vrot.lane.b32.xlu0 %v2573_v6, %s2455_s23 }
 0x149   : > { %v2579_v10 = vpop.permute.xlu0 %507  ;;  %v2582_v11 = vpop.permute.xlu1 %513 }
 0x14a   : > { %594 = vrot.lane.b32.xlu0 %v2579_v10, %s2454_s22 }
 0x14d   : > { %v2584_v12 = vpop.permute.xlu0 %510  ;;  %v593_v18 = vpop.permute.xlu1 %592 }
 0x14e   : > { %598 = vrot.lane.b32.xlu0 %v2582_v11, %s2454_s22  ;;  %596 = vrot.lane.b32.xlu1 %v2584_v12, %s2454_s22 }
 0x1bc   : > { %v595_v21 = vpop.permute.xlu0 %594 }
 0x1c0   : > { %v597_v24 = vpop.permute.xlu1 %596  ;;  %v599_v25 = vpop.permute.xlu0 %598 }
 0x1c1   : > { %v604_v26 = vcombine.low %v593_v18, %v597_v24  ;;  %v605_v27 = vcombine.high %v593_v18, %v597_v24  ;;  %v620_v28 = vcombine.low %v595_v21, %v599_v25  ;;  %v621_v29 = vcombine.high %v595_v21, %v599_v25 }
 0x1c3   : > { %v612_v30 = vrot.slane %v604_v26, %v2592_v22  ;;  %v619_v31 = vrot.slane %v605_v27, %v2592_v22  ;;  %v628_v32 = vrot.slane %v620_v28, %v2592_v22  ;;  %v635_v33 = vrot.slane %v621_v29, %v2592_v22 }
 0x1c5   : > { %v637_v35 = vcombine.high %v612_v30, %v628_v32  ;;  %v636_v36 = vcombine.low %v612_v30, %v628_v32  ;;  %v652_v37 = vcombine.low %v619_v31, %v635_v33  ;;  %v653_v40 = vcombine.high %v619_v31, %v635_v33 }
 0x1c6   : > { %v2458_v30 = vmov 0  }
 0x1c7   : > { %v651_v38 = vrot.slane %v637_v35, %v2599_v34  ;;  %v644_v39 = vrot.slane %v636_v36, %v2599_v34  ;;  %v660_v43 = vrot.slane %v652_v37, %v2599_v34  ;;  %v667_v45 = vrot.slane %v653_v40, %v2599_v34 }
 0x1c9   : > { %v674_v41 = vpack.c.bf16 %v651_v38, %v651_v38  ;;  %v672_v42 = vpack.c.bf16 %v644_v39, %v644_v39  ;;  %v669_v44 = vcombine.high %v651_v38, %v2450_v1  ;;  %v676_v46 = vpack.c.bf16 %v660_v43, %v660_v43 }
 0x1ca   : > { %v670_v48 = vcombine.high %v660_v43, %v2450_v1  ;;  %v668_v49 = vcombine.high %v644_v39, %v2450_v1  ;;  %v671_v52 = vcombine.high %v667_v45, %v2450_v1  ;;  %v678_v54 = vpack.c.bf16 %v667_v45, %v667_v45 }
 0x1cb   : > { %868 = vxpose.xlu0.c.b16.start.end [1/1] (short) (narrow) %v674_v41, 16  ;;  %836 = vxpose.xlu1.c.b16.start.end [1/1] (short) (narrow) %v672_v42, 16  ;;  %v675_v47 = vpack.c.bf16 %v669_v44, %v669_v44 }
 0x1cc   : > { %v677_v50 = vpack.c.bf16 %v670_v48, %v670_v48  ;;  %v673_v51 = vpack.c.bf16 %v668_v49, %v668_v49  ;;  %v679_v53 = vpack.c.bf16 %v671_v52, %v671_v52  ;;  %v532_v48 = vcombine.low %v2579_v10, %v2582_v11 }
 0x1cd   : > { %v533_v49 = vcombine.high %v2579_v10, %v2582_v11 }
 0x1ce   : > { %v540_v52 = vrot.slane %v532_v48, %v2592_v22 }
 0x1cf   : > { %900 = vxpose.xlu0.c.b16.start.end [1/1] (short) (narrow) %v676_v46, 16  ;;  %884 = vxpose.xlu1.c.b16.start.end [1/1] (short) (narrow) %v675_v47, 16  ;;  %v516_v46 = vcombine.low %v2573_v6, %v2584_v12  ;;  %v517_v47 = vcombine.high %v2573_v6, %v2584_v12 }
 0x1d3   : > { %916 = vxpose.xlu1.c.b16.start.end [1/1] (short) (narrow) %v677_v50, 16  ;;  %852 = vxpose.xlu0.c.b16.start.end [1/1] (short) (narrow) %v673_v51, 16  ;;  %v524_v50 = vrot.slane %v516_v46, %v2592_v22  ;;  %v531_v51 = vrot.slane %v517_v47, %v2592_v22 }
 0x1d7   : > { %948 = vxpose.xlu1.c.b16.start.end [1/1] (short) (narrow) %v679_v53, 16  ;;  %932 = vxpose.xlu0.c.b16.start.end [1/1] (short) (narrow) %v678_v54, 16  ;;  %v547_v53 = vrot.slane %v533_v49, %v2592_v22  ;;  %v548_v54 = vcombine.low %v524_v50, %v540_v52 }
 0x22d   : > { %v876_v55 = vpop.trf.xlu0  ;;  %v844_v56 = vpop.trf.xlu1 }
 0x231   : > { %v908_v57 = vpop.trf.xlu0  ;;  %v892_v58 = vpop.trf.xlu1 }
 0x232   : > { %v964_v61 = vcombine.low %v844_v56, %v908_v57  ;;  %v549_v56 = vcombine.high %v524_v50, %v540_v52  ;;  %v565_v57 = vcombine.high %v531_v51, %v547_v53 }
 0x234   : > { %v971_v5 = vrot.slane %v964_v61, %v2592_v22 }
 0x235   : > { %v924_v59 = vpop.trf.xlu1  ;;  %v860_v60 = vpop.trf.xlu0 }
 0x236   : > { %v998_v62 = vcombine.low %v860_v60, %v924_v59  ;;  %v556_v59 = vrot.slane %v548_v54, %v2599_v34 }
 0x238   : > { %v1005_v7 = vrot.slane %v998_v62, %v2592_v22  ;;  %v563_v62 = vrot.slane %v549_v56, %v2599_v34 }
 0x239   : > { %v956_v63 = vpop.trf.xlu1  ;;  %v940_v0 = vpop.trf.xlu0 }
 0x23a   : > { %v1006_v2 = vcombine.low %v892_v58, %v956_v63  ;;  %v972_v4 = vcombine.low %v876_v55, %v940_v0  ;;  %v564_v55 = vcombine.low %v531_v51, %v547_v53  ;;  %v579_v63 = vrot.slane %v565_v57, %v2599_v34 }
 0x23c   : > { %v1013_v8 = vrot.slane %v1006_v2, %v2592_v22  ;;  %v979_v9 = vrot.slane %v972_v4, %v2592_v22  ;;  %v572_v60 = vrot.slane %v564_v55, %v2599_v34  ;;  %v580_v2 = vcombine.high %v556_v59, %v2450_v1 }
 0x23e   : > { %v1014_v13 = vcombine.low %v1005_v7, %v1013_v8  ;;  %v1015_v14 = vcombine.high %v1005_v7, %v1013_v8  ;;  %v980_v16 = vcombine.low %v971_v5, %v979_v9  ;;  %v981_v18 = vcombine.high %v971_v5, %v979_v9 }
 0x23f   : > { %v582_v4 = vcombine.high %v572_v60, %v2450_v1  ;;  %v581_v7 = vcombine.high %v563_v62, %v2450_v1  ;;  %v583_v8 = vcombine.high %v579_v63, %v2450_v1 }
 0x240   : > { %v988_v19 = vrot.slane %v980_v16, %v2599_v34  ;;  %v1022_v20 = vrot.slane %v1014_v13, %v2599_v34  ;;  %v995_v21 = vrot.slane %v981_v18, %v2599_v34  ;;  %v1029_v23 = vrot.slane %v1015_v14, %v2599_v34 }
 0x241   : > { %v2240_v13 = vpack.c.bf16 %v582_v4, %v580_v2  ;;  %v2241_v16 = vpack.c.bf16 %v583_v8, %v581_v7  ;;  %v771_v8 = vand.u32 127, %v521_v15 }
 0x242   : > { %v1034_v24 = vpack.i.b16 %v1022_v20, %v988_v19  ;;  %v1036_v25 = vshrl.u32 %v988_v19, 16  ;;  %v1037_v26 = vshrl.u32 %v1022_v20, 16  ;;  %v1052_v27 = vshrl.u32 %v995_v21, 16 }
 0x243   : > { %v1053_v29 = vshrl.u32 %v1029_v23, 16  ;;  %v996_v31 = vcombine.high %v988_v19, %v2458_v30  ;;  %v1030_v32 = vcombine.high %v1022_v20, %v2458_v30  ;;  %v1050_v33 = vpack.i.b16 %v1029_v23, %v995_v21 }
 0x244   : > { %1064 = vxpose.xlu0.c.b16.start.end [1/1] (short) (narrow) %v1034_v24, 16  ;;  %v1038_v28 = vpack.i.b16 %v1037_v26, %v1036_v25  ;;  %v997_v35 = vcombine.high %v995_v21, %v2458_v30  ;;  %v1031_v39 = vcombine.high %v1029_v23, %v2458_v30  ;;  %v2238_v19 = vpack.c.bf16 %v572_v60, %v556_v59 }
 0x245   : > { %v1054_v36 = vpack.i.b16 %v1053_v29, %v1052_v27  ;;  %v1044_v37 = vshrl.u32 %v996_v31, 16  ;;  %v1045_v38 = vshrl.u32 %v1030_v32, 16  ;;  %v1042_v40 = vpack.i.b16 %v1030_v32, %v996_v31 }
 0x246   : > { %1080 = vxpose.xlu1.c.b16.start.end [1/1] (short) (narrow) %v1038_v28, 16  ;;  %v1060_v42 = vshrl.u32 %v997_v35, 16  ;;  %v1061_v43 = vshrl.u32 %v1031_v39, 16  ;;  %v1058_v44 = vpack.i.b16 %v1031_v39, %v997_v35  ;;  %v2239_v21 = vpack.c.bf16 %v579_v63, %v563_v62 }
 0x247   : > { %v1046_v41 = vpack.i.b16 %v1045_v38, %v1044_v37  ;;  %v806_v26 = vrot.slane %v2240_v13, %v2592_v22  ;;  %v814_v31 = vrot.slane %v2241_v16, %v2592_v22  ;;  %v781_v32 = vrot.slane %v2238_v19, %v2592_v22 }
 0x248   : > { %1128 = vxpose.xlu0.c.b16.start.end [1/1] (short) (narrow) %v1050_v33, 16  ;;  %v1062_v45 = vpack.i.b16 %v1061_v43, %v1060_v42  ;;  %v789_v33 = vrot.slane %v2239_v21, %v2592_v22  ;;  %vm772_vm4 = vcmp.le.s32.totalorder %v771_v8, %v2589_v17 }
 0x24a   : > { %1144 = vxpose.xlu1.c.b16.start.end [1/1] (short) (narrow) %v1054_v36, 16  ;;  %v790_v42 = vcombine.low %v781_v32, %v789_v33 }
 0x24c   : > { %1096 = vxpose.xlu0.c.b16.start.end [1/1] (short) (narrow) %v1042_v40, 16  ;;  %v815_v40 = vcombine.low %v806_v26, %v814_v31  ;;  %v797_v48 = vrot.slane %v790_v42, %v2599_v34 }
 0x24e   : > { %1112 = vxpose.xlu1.c.b16.start.end [1/1] (short) (narrow) %v1046_v41, 16  ;;  %v827_v55 = vshrl.u32 %v797_v48, 16  ;;  %v798_v62 = vcombine.high %v797_v48, %v2458_v30 }
 0x250   : > { %1160 = vxpose.xlu0.c.b16.start.end [1/1] (short) (narrow) %v1058_v44, 16  ;;  %v822_v44 = vrot.slane %v815_v40, %v2599_v34 }
 0x252   : > { %1176 = vxpose.xlu1.c.b16.start.end [1/1] (short) (narrow) %v1062_v45, 16  ;;  %v826_v50 = vpack.i.b16 %v822_v44, %v797_v48  ;;  %v828_v53 = vshrl.u32 %v822_v44, 16  ;;  %v823_v60 = vcombine.high %v822_v44, %v2458_v30 }
 0x254   : > { %v829_v57 = vpack.i.b16 %v828_v53, %v827_v55  ;;  %v834_v4 = vshrl.u32 %v823_v60, 16 }
 0x2a6   : > { %v1072_v58 = vpop.trf.xlu0 }
 0x2a8   : > { %v1088_v61 = vpop.trf.xlu1 }
 0x2aa   : > { %v1136_v0 = vpop.trf.xlu0 }
 0x2ab   : > { %v1192_v18 = vcombine.low %v1072_v58, %v1136_v0  ;;  %v832_v0 = vpack.i.b16 %v823_v60, %v798_v62 }
 0x2ac   : > { %v1152_v5 = vpop.trf.xlu1 }
 0x2ad   : > { %v1217_v23 = vcombine.low %v1088_v61, %v1152_v5  ;;  %v1199_v27 = vrot.slane %v1192_v18, %v2592_v22  ;;  %v833_v5 = vshrl.u32 %v798_v62, 16 }
 0x2ae   : > { %v1104_v9 = vpop.trf.xlu0 }
 0x2af   : > { %v1224_v35 = vrot.slane %v1217_v23, %v2592_v22  ;;  %v835_v7 = vpack.i.b16 %v834_v4, %v833_v5 }
 0x2b0   : > { %v1120_v14 = vpop.trf.xlu1 }
 0x2b2   : > { %v1168_v20 = vpop.trf.xlu0 }
 0x2b3   : > { %v1200_v24 = vcombine.low %v1104_v9, %v1168_v20  ;;  %v2459_v9 = vmov -1e+30  }
 0x2b4   : > { %v1184_v25 = vpop.trf.xlu1  ;;  %v773_v13 = vsel %vm772_vm4, 0.0, %v2459_v9 }
 0x2b5   : > { %v1207_v28 = vrot.slane %v1200_v24, %v2592_v22  ;;  %v1225_v29 = vcombine.low %v1120_v14, %v1184_v25 }
 0x2b7   : > { %v1208_v36 = vcombine.low %v1199_v27, %v1207_v28  ;;  %v1232_v37 = vrot.slane %v1225_v29, %v2592_v22 }
 0x2b9   : > { %v1215_v38 = vrot.slane %v1208_v36, %v2599_v34  ;;  %v1233_v39 = vcombine.low %v1224_v35, %v1232_v37 }
 0x2bb   : > { %v1240_v41 = vrot.slane %v1233_v39, %v2599_v34  ;;  %v1245_v45 = vshrl.u32 %v1215_v38, 16  ;;  %v1216_v54 = vcombine.high %v1215_v38, %v2458_v30 }
 0x2bd   : > { %v1244_v43 = vpack.i.b16 %v1240_v41, %v1215_v38  ;;  %v1246_v46 = vshrl.u32 %v1240_v41, 16  ;;  %v1241_v52 = vcombine.high %v1240_v41, %v2458_v30  ;;  %v1251_v61 = vshrl.u32 %v1216_v54, 16 }
 0x2bf   : > { %v1260_v47 = vsel %vm1258_vm2, %v1244_v43, 0  ;;  %v1247_v49 = vpack.i.b16 %v1246_v46, %v1245_v45  ;;  %v1250_v56 = vpack.i.b16 %v1241_v52, %v1216_v54  ;;  %v1252_v59 = vshrl.u32 %v1241_v52, 16 }
 0x2c0   : > { %2315 = vmatpush3.bf16.msra.mxu1 %v1260_v47 }
 0x2c1   : > { %2320 = vmatprep.subr.bf16.mxu1 %v2450_v1  ;;  %v1306_v51 = vsel %vm1258_vm2, %v1247_v49, 0  ;;  %v1352_v58 = vsel %vm1258_vm2, %v1250_v56, 0  ;;  %v1253_v63 = vpack.i.b16 %v1252_v59, %v1251_v61 }
 0x2c3   : > { %2317 = vmatmul.mubr.msk.bf16.vlgmr.msra.gmra.mxu1 %vm1254_vm3, %v826_v50  ;;  %v1398_v2 = vsel %vm1258_vm2, %v1253_v63, 0 }
 0x2c4   : > { %2321 = vmatpush3.bf16.msra.mxu1 %v1306_v51  ;;  %2322 = vmatprep.mubr.msk.bf16.mxu1 %vm2451_vm0, %v2450_v1 }
 0x2c5   : > { %2326 = vmatprep.subr.bf16.mxu1 %v2450_v1 }
 0x2cb   : > { %2323 = vmatmul.mubr.msk.bf16.vlgmr.msra.gmra.mxu1 %vm1254_vm3, %v829_v57 }
 0x2cc   : > { %2327 = vmatpush3.bf16.msra.mxu1 %v1352_v58  ;;  %2328 = vmatprep.mubr.msk.bf16.mxu1 %vm2451_vm0, %v2450_v1 }
 0x2cd   : > { %2332 = vmatprep.subr.bf16.mxu1 %v2450_v1 }
 0x2d3   : > { %2329 = vmatmul.mubr.msk.bf16.vlgmr.msra.gmra.mxu1 %vm1254_vm3, %v832_v0 }
 0x2d4   : > { %2333 = vmatpush3.bf16.msra.mxu1 %v1398_v2  ;;  %2334 = vmatprep.mubr.msk.bf16.mxu1 %vm2451_vm0, %v2450_v1 }
 0x2d5   : > { %2344 = vmatprep.subr.bf16.mxu1 %v2450_v1 }
 0x2db   : > { %2335 = vmatmul.mubr.msk.bf16.vlgmr.msra.gmra.mxu1 %vm1254_vm3, %v835_v7 }
 0x2dc   : > { %2346 = vmatprep.mubr.msk.bf16.mxu1 %vm2451_vm0, %v2450_v1 }
 0x383   : > { %v1296_v14 = vpop.f32.mrf.mxu1 }
 0x384   : > { %v1297_v16 = vadd.f32 %v1296_v14, %v773_v13 }
 0x385   : > { %v2318_v18 = vpop.f32.mrf.mxu1 }
 0x386   : > { %v1440_v19 = vsel %vm1254_vm3, %v1297_v16, -inf }
 0x387   : > { %1441 = vmax.xlane.f32.xlu0 %v1440_v19  ;;  %v1299_v20 = vpop.f32.mrf.mxu1 }
 0x389   : > { %v2319_v21 = vpop.f32.mrf.mxu1 }
 0x38b   : > { %v1342_v23 = vpop.f32.mrf.mxu1 }
 0x38c   : > { %v1343_v24 = vadd.f32 %v1342_v23, %v773_v13 }
 0x38d   : > { %v2324_v25 = vpop.f32.mrf.mxu1 }
 0x38e   : > { %v1443_v26 = vsel %vm1254_vm3, %v1343_v24, -inf }
 0x38f   : > { %1444 = vmax.xlane.f32.xlu1 %v1443_v26  ;;  %v1345_v27 = vpop.f32.mrf.mxu1 }
 0x391   : > { %v2325_v15 = vpop.f32.mrf.mxu1 }
 0x393   : > { %v1388_v28 = vpop.f32.mrf.mxu1 }
 0x394   : > { %v1389_v17 = vadd.f32 %v1388_v28, %v773_v13 }
 0x395   : > { %v2330_v29 = vpop.f32.mrf.mxu1 }
 0x396   : > { %v1446_v31 = vsel %vm1254_vm3, %v1389_v17, -inf }
 0x397   : > { %1447 = vmax.xlane.f32.xlu0 %v1446_v31  ;;  %v1391_v32 = vpop.f32.mrf.mxu1 }
 0x399   : > { %v2331_v33 = vpop.f32.mrf.mxu1 }
 0x39b   : > { %v1434_v35 = vpop.f32.mrf.mxu1 }
 0x39c   : > { %v1435_v36 = vadd.f32 %v1434_v35, %v773_v13 }
 0x39d   : > { %v2336_v37 = vpop.f32.mrf.mxu1 }
 0x39e   : > { %v1449_v38 = vsel %vm1254_vm3, %v1435_v36, -inf }
 0x39f   : > { %1450 = vmax.xlane.f32.xlu1 %v1449_v38  ;;  %v1437_v39 = vpop.f32.mrf.mxu1 }
 0x3a1   : > { %v2337_v40 = vpop.f32.mrf.mxu1 }
 0x3ad   : > { %680 = vrot.lane.b32.xlu0 %v2573_v6, %s2460_s24 }
 0x3b0   : > { %682 = vrot.lane.b32.xlu1 %v2579_v10, %s2460_s24 }
 0x410   : > { %v1442_v41 = vpop.xlane.xlu0 %1441 }
 0x411   : > { %v1452_v42 = vsub.f32 %v1297_v16, %v1442_v41 }
 0x413   : > { %v1456_v43 = vmul.f32 1.442695, %v1452_v42 }
 0x415   : > { %2422 = vpow2.f32 %v1456_v43 }
 0x418   : > { %v1445_v44 = vpop.xlane.xlu1 %1444 }
 0x419   : > { %v1453_v45 = vsub.f32 %v1343_v24, %v1445_v44 }
 0x41b   : > { %v1458_v46 = vmul.f32 1.442695, %v1453_v45 }
 0x41d   : > { %2424 = vpow2.f32 %v1458_v46 }
 0x420   : > { %v1448_v52 = vpop.xlane.xlu0 %1447 }
 0x421   : > { %v1454_v53 = vsub.f32 %v1389_v17, %v1448_v52 }
 0x422   : > { %v2685_v47 = vpop.eup %2422 }
 0x423   : > { %v1464_v48 = vsel %vm1254_vm3, %v2685_v47, 0.0  ;;  %v1460_v54 = vmul.f32 1.442695, %v1454_v53 }
 0x424   : > { %1465 = vadd.xlane.f32.xlu0 %v1464_v48 }
 0x428   : > { %v1451_v10 = vpop.xlane.xlu1 %1450 }
 0x429   : > { %v1455_v50 = vsub.f32 %v1435_v36, %v1451_v10 }
 0x42a   : > { %v2689_v49 = vpop.eup %2424 }
 0x42b   : > { %v1467_v6 = vsel %vm1254_vm3, %v2689_v49, 0.0  ;;  %v1462_v51 = vmul.f32 1.442695, %v1455_v50 }
 0x42c   : > { %1468 = vadd.xlane.f32.xlu1 %v1467_v6  ;;  %v683_v59 = vpop.permute.xlu1 %682 }
 0x42d   : > { %2426 = vpow2.f32 %v1462_v51 }
 0x42e   : > { %2428 = vpow2.f32 %v1460_v54 }
 0x43a   : > { %686 = vrot.lane.b32.xlu0 %v2582_v11, %s2460_s24  ;;  %v2695_v55 = vpop.eup %2426 }
 0x43b   : > { %v1473_v56 = vsel %vm1254_vm3, %v2695_v55, 0.0  ;;  %v2699_v57 = vpop.eup %2428 }
 0x43c   : > { %v1470_v11 = vsel %vm1254_vm3, %v2699_v57, 0.0 }
 0x43d   : > { %684 = vrot.lane.b32.xlu1 %v2584_v12, %s2460_s24  ;;  %v681_v12 = vpop.permute.xlu0 %680 }
 0x459   : > { %1474 = vadd.xlane.f32.xlu0 %v1473_v56 }
 0x461   : > { %1471 = vadd.xlane.f32.xlu1 %v1470_v11 }
 0x4ad   : > { %v1466_v58 = vpop.xlane.xlu0 %1465 }
 0x4ae   : > { %2430 = vrcp.f32 %v1466_v58 }
 0x4b1   : > { %v687_v60 = vpop.permute.xlu0 %686 }
 0x4b2   : > { %v708_v62 = vcombine.low %v683_v59, %v687_v60  ;;  %v709_v63 = vcombine.high %v683_v59, %v687_v60 }
 0x4b4   : > { %v716_v5 = vrot.slane %v708_v62, %v2592_v22  ;;  %v723_v7 = vrot.slane %v709_v63, %v2592_v22 }
 0x4b5   : > { %v1469_v61 = vpop.xlane.xlu1 %1468 }
 0x4b6   : > { %2432 = vrcp.f32 %v1469_v61 }
 0x4b9   : > { %v685_v0 = vpop.permute.xlu1 %684 }
 0x4ba   : > { %v692_v2 = vcombine.low %v681_v12, %v685_v0  ;;  %v693_v4 = vcombine.high %v681_v12, %v685_v0 }
 0x4bb   : > { %v2431_v37 = vpop.eup %2430 }
 0x4bc   : > { %v700_v8 = vrot.slane %v692_v2, %v2592_v22  ;;  %v707_v9 = vrot.slane %v693_v4, %v2592_v22  ;;  %v1477_v42 = vmul.f32 %v2431_v37, %v2685_v47 }
 0x4be   : > { %v724_v13 = vcombine.low %v700_v8, %v716_v5  ;;  %v725_v14 = vcombine.high %v700_v8, %v716_v5  ;;  %v740_v16 = vcombine.low %v707_v9, %v723_v7  ;;  %v741_v18 = vcombine.high %v707_v9, %v723_v7 }
 0x4bf   : > { %v1484_v56 = vpack.c.bf16 %v1477_v42, %v1477_v42 }
 0x4c0   : > { %v732_v19 = vrot.slane %v724_v13, %v2599_v34  ;;  %v739_v20 = vrot.slane %v725_v14, %v2599_v34  ;;  %v748_v21 = vrot.slane %v740_v16, %v2599_v34  ;;  %v755_v23 = vrot.slane %v741_v18, %v2599_v34 }
 0x4c2   : > { %v756_v24 = vcombine.high %v732_v19, %v2450_v1  ;;  %v757_v25 = vcombine.high %v739_v20, %v2450_v1  ;;  %v758_v26 = vcombine.high %v748_v21, %v2450_v1  ;;  %v759_v27 = vcombine.high %v755_v23, %v2450_v1 }
 0x4c3   : > { %v2246_v15 = vpack.c.bf16 %v748_v21, %v732_v19  ;;  %v2247_v28 = vpack.c.bf16 %v755_v23, %v739_v20  ;;  %v2433_v40 = vpop.eup %2432 }
 0x4c4   : > { %v2248_v17 = vpack.c.bf16 %v758_v26, %v756_v24  ;;  %v2249_v29 = vpack.c.bf16 %v759_v27, %v757_v25  ;;  %v1479_v6 = vmul.f32 %v2433_v40, %v2689_v49 }
 0x4c5   : > { %v1495_v31 = vrot.slane %v2246_v15, %v2592_v22  ;;  %v1503_v32 = vrot.slane %v2247_v28, %v2592_v22 }
 0x4c6   : > { %v1520_v33 = vrot.slane %v2248_v17, %v2592_v22  ;;  %v1528_v35 = vrot.slane %v2249_v29, %v2592_v22  ;;  %v1485_v11 = vpack.c.bf16 %v1479_v6, %v1479_v6 }
 0x4c7   : > { %v1504_v36 = vcombine.low %v1495_v31, %v1503_v32 }
 0x4c8   : > { %v1529_v38 = vcombine.low %v1520_v33, %v1528_v35 }
 0x4c9   : > { %v1511_v39 = vrot.slane %v1504_v36, %v2599_v34  ;;  %v2414_v36 = vld [vmem:[%s2835_s3 + $0x8] sm:$0xff]  }
 0x4ca   : > { %v1536_v41 = vrot.slane %v1529_v38, %v2599_v34 }
 0x4cb   : > { %v1512_v43 = vcombine.high %v1511_v39, %v2458_v30  ;;  %v1541_v45 = vshrl.u32 %v1511_v39, 16 }
 0x4cc   : > { %v1540_v44 = vpack.i.b16 %v1536_v41, %v1511_v39  ;;  %v1542_v46 = vshrl.u32 %v1536_v41, 16  ;;  %v1537_v48 = vcombine.high %v1536_v41, %v2458_v30 }
 0x4cd   : > { %v1547_v10 = vshrl.u32 %v1512_v43, 16 }
 0x4ce   : > { %v1554_v50 = vsel %vm1258_vm2, %v1540_v44, 0  ;;  %v1543_v51 = vpack.i.b16 %v1542_v46, %v1541_v45  ;;  %v1546_v52 = vpack.i.b16 %v1537_v48, %v1512_v43  ;;  %v1548_v53 = vshrl.u32 %v1537_v48, 16  ;;  %v2415_v45 = vld [vmem:[%s2835_s3] sm:$0xff]  }
 0x4cf   : > { %2339 = vmatpush3.bf16.msra.mxu0 %v1554_v50 }
 0x4d0   : > { %v1600_v54 = vsel %vm1258_vm2, %v1543_v51, 0  ;;  %2350 = vmatprep.subr.bf16.mxu0 %v2450_v1  ;;  %v1549_v47 = vpack.i.b16 %v1548_v53, %v1547_v10  ;;  %v1646_v30 = vsel %vm1258_vm2, %v1546_v52, 0 }
 0x4d1   : > { %2345 = vmatpush3.bf16.msra.mxu1 %v1600_v54 }
 0x4d2   : > { %2341 = vmatmul.mubr.msk.bf16.vlgmr.msra.gmra.mxu0 %vm1254_vm3, %v1484_v56  ;;  %2356 = vmatprep.subr.bf16.mxu1 %v2450_v1  ;;  %v1692_v49 = vsel %vm1258_vm2, %v1549_v47, 0 }
 0x4d3   : > { %2351 = vmatpush3.bf16.msra.mxu0 %v1646_v30  ;;  %2352 = vmatprep.mubr.msk.bf16.mxu0 %vm2451_vm0, %v2450_v1 }
 0x4d4   : > { %2347 = vmatmul.mubr.msk.bf16.vlgmr.msra.gmra.mxu1 %vm1254_vm3, %v1485_v11  ;;  %2362 = vmatprep.subr.bf16.mxu0 %v2450_v1 }
 0x4d5   : > { %2357 = vmatpush3.bf16.msra.mxu1 %v1692_v49  ;;  %2358 = vmatprep.mubr.msk.bf16.mxu1 %vm2451_vm0, %v2450_v1 }
 0x4d6   : > { %2370 = vmatprep.subr.bf16.mxu1 %v2450_v1 }
 0x4e2   : > { %v1475_v12 = vpop.xlane.xlu0 %1474 }
 0x4e3   : > { %2434 = vrcp.f32 %v1475_v12 }
 0x4ea   : > { %v1472_v58 = vpop.xlane.xlu1 %1471 }
 0x4eb   : > { %2436 = vrcp.f32 %v1472_v58 }
 0x4f0   : > { %v2435_v59 = vpop.eup %2434 }
 0x4f1   : > { %v1483_v60 = vmul.f32 %v2435_v59, %v2695_v55 }
 0x4f3   : > { %v1487_v61 = vpack.c.bf16 %v1483_v60, %v1483_v60 }
 0x4f5   : > { %2359 = vmatmul.mubr.msk.bf16.vlgmr.msra.gmra.mxu1 %vm1254_vm3, %v1487_v61 }
 0x4f6   : > { %2374 = vmatprep.mubr.msk.bf16.mxu1 %vm2451_vm0, %v2450_v1 }
 0x4f8   : > { %v2437_v62 = vpop.eup %2436 }
 0x4f9   : > { %v1481_v63 = vmul.f32 %v2437_v62, %v2699_v57 }
 0x4fb   : > { %v1486_v0 = vpack.c.bf16 %v1481_v63, %v1481_v63 }
 0x4fd   : > { %2353 = vmatmul.mubr.msk.bf16.vlgmr.msra.gmra.mxu0 %vm1254_vm3, %v1486_v0  ;;  %v2256_v0 = vld [vmem:[%s2836_s4] ss:$0 sm:$0xff] }
 0x4fe   : > { %2366 = vmatprep.mubr.msk.bf16.mxu0 %vm2451_vm0, %v2450_v1  ;;  %2363 = vmatpush3.bf16.msra.mxu0 %v2414_v36  ;;  %v2420_v36 = vld [vmem:[%s2841_s9 + $0x8] sm:$0xff]  }
 0x4ff   : > { %2364 = vmatprep.subr.bf16.mxu0 %v2450_v1 }
 0x502   : > { %2365 = vmatpush3.bf16.msra.mxu0 %v2415_v45 }
 0x503   : > { %2378 = vmatprep.subr.bf16.mxu0 %v2450_v1 }
 0x592   : > { %v1590_v2 = vpop.f32.mrf.mxu0 }
 0x594   : > { %v2342_v4 = vpop.f32.mrf.mxu0  ;;  %v1636_v5 = vpop.f32.mrf.mxu1 }
 0x596   : > { %v1593_v7 = vpop.f32.mrf.mxu0  ;;  %v2348_v55 = vpop.f32.mrf.mxu1 }
 0x598   : > { %v2343_v8 = vpop.f32.mrf.mxu0  ;;  %v1639_v9 = vpop.f32.mrf.mxu1 }
 0x59a   : > { %v2349_v13 = vpop.f32.mrf.mxu1 }
 0x5b5   : > { %v1728_v14 = vpop.f32.mrf.mxu1 }
 0x5b6   : > { %v1750_v20 = vcombine.low %v1636_v5, %v1728_v14  ;;  %v1751_v57 = vcombine.high %v1636_v5, %v1728_v14 }
 0x5b7   : > { %v2360_v16 = vpop.f32.mrf.mxu1 }
 0x5b8   : > { %v1758_v26 = vrot.slane %v1750_v20, %v2592_v22  ;;  %v1765_v27 = vrot.slane %v1751_v57, %v2592_v22  ;;  %v2419_v20 = vld [vmem:[%s2841_s9 + $0x10] sm:$0xff]  }
 0x5b9   : > { %v1731_v18 = vpop.f32.mrf.mxu1 }
 0x5ba   : > { %v2416_v18 = vld [vmem:[%s2839_s7 + $0x8] sm:$0xff]  }
 0x5bb   : > { %v2361_v19 = vpop.f32.mrf.mxu1  ;;  %2371 = vmatpush3.bf16.msra.mxu1 %v2416_v18 }
 0x5bc   : > { %2372 = vmatprep.subr.bf16.mxu1 %v2450_v1  ;;  %v2418_v19 = vld [vmem:[%s2841_s9 + $0x18] sm:$0xff]  }
 0x5bd   : > { %v1682_v21 = vpop.f32.mrf.mxu0 }
 0x5be   : > { %v1734_v23 = vcombine.low %v1590_v2, %v1682_v21  ;;  %v1735_v24 = vcombine.high %v1590_v2, %v1682_v21  ;;  %v438_v2 = vunpack.c.l.bf16 %v2564_v3  ;;  %v2417_v3 = vld [vmem:[%s2839_s7] sm:$0xff]  }
 0x5bf   : > { %v2354_v25 = vpop.f32.mrf.mxu0  ;;  %2373 = vmatpush3.bf16.msra.mxu1 %v2417_v3 }
 0x5c0   : > { %v1742_v15 = vrot.slane %v1734_v23, %v2592_v22  ;;  %v1749_v28 = vrot.slane %v1735_v24, %v2592_v22 }
 0x5c1   : > { %v1685_v17 = vpop.f32.mrf.mxu0 }
 0x5c2   : > { %v1766_v29 = vcombine.low %v1742_v15, %v1758_v26  ;;  %v1767_v31 = vcombine.high %v1742_v15, %v1758_v26  ;;  %v1782_v32 = vcombine.low %v1749_v28, %v1765_v27  ;;  %v1783_v33 = vcombine.high %v1749_v28, %v1765_v27  ;;  %v2260_v17 = vld [vmem:[%s2837_s5] ss:$0 sm:$0xff] }
 0x5c3   : > { %v2355_v35 = vpop.f32.mrf.mxu0 }
 0x5c4   : > { %v1774_v37 = vrot.slane %v1766_v29, %v2599_v34  ;;  %v1781_v38 = vrot.slane %v1767_v31, %v2599_v34  ;;  %v1790_v39 = vrot.slane %v1782_v32, %v2599_v34  ;;  %v1797_v40 = vrot.slane %v1783_v33, %v2599_v34  ;;  %v2261_v31 = vld [vmem:[%s2838_s6] ss:$0 sm:$0xff] }
 0x5c6   : > { %v1802_v41 = vcombine.low %v1774_v37, %v1781_v38  ;;  %v2254_v42 = vcombine.high %v1774_v37, %v1781_v38  ;;  %v1818_v43 = vcombine.low %v1790_v39, %v1797_v40  ;;  %v2255_v44 = vcombine.high %v1790_v39, %v1797_v40  ;;  %v2421_v37 = vld [vmem:[%s2841_s9] sm:$0xff]  }
 0x5c7   : > { %v2262_v38 = vld [vmem:[%s2840_s8] ss:$0 sm:$0xff] }
 0x5c8   : > { %v1809_v46 = vrot.slane %v1802_v41, %v2592_v22  ;;  %v1817_v48 = vrot.slane %v2254_v42, %v2592_v22  ;;  %v1825_v6 = vrot.slane %v1818_v43, %v2592_v22  ;;  %v1833_v10 = vrot.slane %v2255_v44, %v2592_v22 }
 0x5ca   : > { %v1835_v50 = vcombine.high %v1809_v46, %v1817_v48  ;;  %v1851_v51 = vcombine.high %v1825_v6, %v1833_v10  ;;  %v1834_v52 = vcombine.low %v1809_v46, %v1817_v48  ;;  %v1850_v53 = vcombine.low %v1825_v6, %v1833_v10 }
 0x5cc   : > { %v1849_v54 = vrot.slane %v1835_v50, %v2599_v34  ;;  %v1865_v56 = vrot.slane %v1851_v51, %v2599_v34  ;;  %v1842_v47 = vrot.slane %v1834_v52, %v2599_v34  ;;  %v1858_v30 = vrot.slane %v1850_v53, %v2599_v34 }
 0x5ce   : > { %v1868_v11 = vcombine.low %v1849_v54, %v1865_v56  ;;  %v1867_v49 = vcombine.high %v1842_v47, %v1858_v30  ;;  %v1866_v12 = vcombine.low %v1842_v47, %v1858_v30  ;;  %v1869_v22 = vcombine.high %v1849_v54, %v1865_v56 }
 0x5d0   : > { %1875 = vrot.lane.b32.xlu1 %v1868_v11, %s2461_s15  ;;  %1871 = vrot.lane.b32.xlu0 %v1867_v49, %s2462_s16 }
 0x5d4   : > { %1879 = vrot.lane.b32.xlu1 %v1869_v22, %s2463_s17 }
 0x642   : > { %v1876_v58 = vpop.permute.xlu1 %1875  ;;  %v1872_v59 = vpop.permute.xlu0 %1871 }
 0x643   : > { %v1882_v60 = vsel %vm1254_vm3, %v1866_v12, %v1872_v59 }
 0x644   : > { %v1884_v62 = vsel %vm1883_vm5, %v1882_v60, %v1876_v58  ;;  %v2272_v60 = vld [vmem:[%s2843_s11] ss:$0 sm:$0xff] }
 0x646   : > { %v1880_v61 = vpop.permute.xlu1 %1879 }
 0x647   : > { %v1886_v63 = vsel %vm1885_vm6, %v1884_v62, %v1880_v61  ;;  %v2273_v62 = vld [vmem:[%s2844_s12] ss:$0 sm:$0xff] }
 0x648   : > { %v1887_v34 = vpack.c.bf16 %v1886_v63, %v1886_v63 }
 0x64a   : > { %2367 = vmatmul.mubr.msk.bf16.vlgmr.msra.gmra.mxu0 %vm462_vm1, %v1887_v34 }
 0x64b   : > { %2386 = vmatprep.mubr.msk.bf16.mxu0 %vm2451_vm0, %v2450_v1  ;;  %2379 = vmatpush3.bf16.msra.mxu0 %v2418_v19 }
 0x64c   : > { %2380 = vmatprep.subr.bf16.mxu0 %v2450_v1 }
 0x64f   : > { %2381 = vmatpush3.bf16.msra.mxu0 %v2419_v20 }
 0x650   : > { %2382 = vmatprep.subr.bf16.mxu0 %v2450_v1 }
 0x653   : > { %2383 = vmatpush3.bf16.msra.mxu0 %v2420_v36 }
 0x654   : > { %2384 = vmatprep.subr.bf16.mxu0 %v2450_v1  ;;  %v2266_v1 = vld [vmem:[%s2842_s10] ss:$0 sm:$0xff] }
 0x657   : > { %2385 = vmatpush3.bf16.msra.mxu0 %v2421_v37 }
 0x70a   : > { %v1948_v4 = vpop.f32.mrf.mxu0 }
 0x70b   : > { %v1949_v5 = vadd.f32 %v2256_v0, %v1948_v4 }
 0x70c   : > { %v2368_v7 = vpop.f32.mrf.mxu0 }
 0x70d   : > { %v1954_v55 = vadd.f32 %v1949_v5, %v438_v2 }
 0x70e   : > { %v1951_v8 = vpop.f32.mrf.mxu0 }
 0x70f   : > { %v1957_v9 = vsel %vm462_vm1, %v1954_v55, 0.0  ;;  %v1962_v13 = vmul.f32 %v1954_v55, %v1954_v55 }
 0x710   : > { %v2369_v14 = vpop.f32.mrf.mxu0  ;;  %1958 = vadd.xlane.f32.xlu0 %v1957_v9 }
 0x711   : > { %v1963_v16 = vsel %vm462_vm1, %v1962_v13, 0.0 }
 0x712   : > { %1964 = vadd.xlane.f32.xlu1 %v1963_v16 }
 0x799   : > { %v1959_v57 = vpop.xlane.xlu0 %1958 }
 0x79a   : > { %v1961_v21 = vmul.f32 0.03125, %v1959_v57 }
 0x79b   : > { %v1965_v23 = vpop.xlane.xlu1 %1964 }
 0x79c   : > { %v1967_v24 = vmul.f32 %v1961_v21, %v1961_v21  ;;  %v1966_v25 = vmul.f32 0.03125, %v1965_v23  ;;  %v1969_v15 = vsub.f32 %v1954_v55, %v1961_v21 }
 0x79e   : > { %v1968_v26 = vsub.f32 %v1966_v25, %v1967_v24 }
 0x7a0   : > { %v1970_v27 = vadd.f32 1e-05, %v1968_v26 }
 0x7a2   : > { %2438 = vrsqrt.f32 %v1970_v27 }
 0x7af   : > { %v2439_v28 = vpop.eup %2438 }
 0x7b0   : > { %v1972_v29 = vmul.f32 %v2439_v28, %v1969_v15 }
 0x7b2   : > { %v1979_v32 = vmul.f32 %v2260_v17, %v1972_v29 }
 0x7b4   : > { %v1986_v33 = vadd.f32 %v2261_v31, %v1979_v32 }
 0x7b6   : > { %v1987_v35 = vpack.c.bf16 %v1986_v33, %v1986_v33 }
 0x7b8   : > { %2375 = vmatmul.mubr.msk.bf16.vlgmr.msra.gmra.mxu1 %vm462_vm1, %v1987_v35 }
 0x878   : > { %v2048_v39 = vpop.f32.mrf.mxu1 }
 0x879   : > { %v2049_v40 = vadd.f32 %v2262_v38, %v2048_v39 }
 0x87a   : > { %v2376_v41 = vpop.f32.mrf.mxu1 }
 0x87b   : > { %v2054_v42 = vmax.f32 %v2049_v40, 0.0 }
 0x87c   : > { %v2051_v43 = vpop.f32.mrf.mxu1 }
 0x87d   : > { %v2055_v44 = vpack.c.bf16 %v2054_v42, %v2054_v42 }
 0x87e   : > { %v2377_v45 = vpop.f32.mrf.mxu1 }
 0x87f   : > { %2387 = vmatmul.mubr.msk.bf16.vlgmr.msra.gmra.mxu0 %vm2095_vm7, %v2055_v44 }
 0x93f   : > { %v2133_v46 = vpop.f32.mrf.mxu0 }
 0x940   : > { %v2134_v48 = vadd.f32 %v2266_v1, %v2133_v46 }
 0x941   : > { %v2388_v6 = vpop.f32.mrf.mxu0 }
 0x942   : > { %v2139_v10 = vadd.f32 %v2134_v48, %v1986_v33 }
 0x943   : > { %v2136_v50 = vpop.f32.mrf.mxu0 }
 0x944   : > { %v2142_v51 = vsel %vm462_vm1, %v2139_v10, 0.0  ;;  %v2146_v52 = vmul.f32 %v2139_v10, %v2139_v10 }
 0x945   : > { %2143 = vadd.xlane.f32.xlu0 %v2142_v51  ;;  %v2389_v53 = vpop.f32.mrf.mxu0 }
 0x946   : > { %v2147_v54 = vsel %vm462_vm1, %v2146_v52, 0.0 }
 0x949   : > { %2148 = vadd.xlane.f32.xlu0 %v2147_v54 }
 0x9ce   : > { %v2144_v56 = vpop.xlane.xlu0 %2143 }
 0x9cf   : > { %v2145_v47 = vmul.f32 0.03125, %v2144_v56 }
 0x9d1   : > { %v2151_v11 = vmul.f32 %v2145_v47, %v2145_v47  ;;  %v2153_v58 = vsub.f32 %v2139_v10, %v2145_v47 }
 0x9d2   : > { %v2149_v30 = vpop.xlane.xlu0 %2148 }
 0x9d3   : > { %v2150_v49 = vmul.f32 0.03125, %v2149_v30 }
 0x9d5   : > { %v2152_v12 = vsub.f32 %v2150_v49, %v2151_v11 }
 0x9d7   : > { %v2154_v22 = vadd.f32 1e-05, %v2152_v12 }
 0x9d9   : > { %2440 = vrsqrt.f32 %v2154_v22 }
 0x9e6   : > { %v2441_v59 = vpop.eup %2440 }
 0x9e7   : > { %v2156_v61 = vmul.f32 %v2441_v59, %v2153_v58 }
 0x9e9   : > { %v2163_v63 = vmul.f32 %v2272_v60, %v2156_v61 }
 0x9eb   : > { %v2170_v34 = vadd.f32 %v2273_v62, %v2163_v63 }
 0x9ed   : > { %v2171_v0 = vpack.c.bf16 %v2170_v34, %v2170_v34 }
 0x9ef   : > { %2173 = vst.msk [vmem:[%s435_s18] sm:$0xf] %vm2172_vm8, %v2171_v0 }
 0x9f0 PF: > { %s23_s25 = sadd.s32 1, %s2448_s25  }
 0x9f1   : > { %p20_p4 = scmp.ge.s32.totalorder %s23_s25, 4  }
 0x9f3   :  { %22 = sbr.rel (!%p20_p4) target bundleno = 1 (0x1), region = 102 }

</bundles_post_ra>
